<compile_context>
chip_gen: v5e
topology: v5e:2x2
jax: 0.10.0
libtpu: 0.0.40
codegen_flags: <defaults>
</compile_context>

<pallas_src>
import functools
import math

import jax
import jax.numpy as jnp
import numpy as np
from jax.experimental import pallas as pl
from jax.experimental.pallas import tpu as pltpu


# ---------------------------------------------------------------------------
# In-kernel helpers (traced inside the Pallas kernel body)
# ---------------------------------------------------------------------------
def _layer_norm(x, g, b, eps=1e-5):
    # x: (R, D) f32, g/b: (1, D) f32
    mu = jnp.mean(x, axis=-1, keepdims=True)
    xc = x - mu
    var = jnp.mean(xc * xc, axis=-1, keepdims=True)
    return xc * jax.lax.rsqrt(var + eps) * g + b


def _split_heads(m2, n_batch, rows, num_heads, dk):
    """(n_batch*rows, num_heads*dk) f32 -> (n_batch*num_heads, rows, dk).

    Static row/lane slices + a leading-axis stack, so the attention core needs
    only ONE batched MXU contraction per stage (no per-head matmuls/concats).
    """
    parts = [m2[b * rows:(b + 1) * rows, h * dk:(h + 1) * dk]
             for b in range(n_batch) for h in range(num_heads)]
    return jnp.stack(parts, axis=0)


def _merge_heads(ctx, n_batch, num_heads):
    """(n_batch*num_heads, rows, dk) f32 -> (n_batch*rows, num_heads*dk)."""
    per_batch = [jnp.concatenate([ctx[b * num_heads + h] for h in range(num_heads)],
                                 axis=-1)
                 for b in range(n_batch)]
    return per_batch[0] if n_batch == 1 else jnp.concatenate(per_batch, axis=0)


def _rep_heads(bias3, num_heads):
    """(Bb, a, c) -> (Bb*H, a, c): replicate each batch's additive bias per head
    using only leading-axis slices + concat (no minor-dim data movement)."""
    if num_heads == 1:
        return bias3
    n_batch = bias3.shape[0]
    return jnp.concatenate(
        [bias3[b:b + 1] for b in range(n_batch) for _ in range(num_heads)], axis=0)


def _attention(q2, k2, v2, bias_n, wo, bo, n_batch, tq, tk, num_heads, dk):
    """Batched-over-(batch, head) attention core.

    q2: (Bb*tq, D) f32 (1/sqrt(dk) already folded into the Q projection)
    k2, v2: (Bb*tk, D) f32; bias_n: (Bb*H, tq|1, tk) additive f32
    wo: (D, D) bf16; bo: (1, D) f32.
    """
    bf16, f32 = jnp.bfloat16, jnp.float32
    qh = _split_heads(q2, n_batch, tq, num_heads, dk).astype(bf16)   # (N, tq, dk)
    kh = _split_heads(k2, n_batch, tk, num_heads, dk).astype(bf16)   # (N, tk, dk)
    vh = _split_heads(v2, n_batch, tk, num_heads, dk).astype(bf16)   # (N, tk, dk)

    # TODO(synk): for long sequences, tile tk with an online-softmax (flash)
    # accumulation instead of materializing the full (N, tq, tk) score block.
    s = jnp.einsum('nqd,nkd->nqk', qh, kh, preferred_element_type=f32) + bias_n
    s = s - jnp.max(s, axis=-1, keepdims=True)
    p = jnp.exp(s)
    p = p * pl.reciprocal(jnp.sum(p, axis=-1, keepdims=True), approx=True)
    ctx = jnp.einsum('nqk,nkd->nqd', p.astype(bf16), vh, preferred_element_type=f32)
    ctx2 = _merge_heads(ctx, n_batch, num_heads)                     # (Bb*tq, D)
    return jnp.dot(ctx2.astype(bf16), wo, preferred_element_type=f32) + bo


# ---------------------------------------------------------------------------
# Pallas kernel: one block of `block_b` batch elements per grid step
# ---------------------------------------------------------------------------
def decoder_layer_kernel(num_heads,
                         x_ref, enc_ref, tbias_ref, sbias_ref,
                         wqkv_s_ref, bqkv_s_ref, wo_s_ref, bo_s_ref,
                         wq_c_ref, bq_c_ref, wkv_c_ref, bkv_c_ref,
                         wo_c_ref, bo_c_ref,
                         w1_ref, b1_ref, w2_ref, b2_ref,
                         ln_g_ref, ln_b_ref,
                         out_ref):
    bf16, f32 = jnp.bfloat16, jnp.float32
    n_batch, t_len, _ = tbias_ref.shape           # (Bb, T, T)
    s_len = sbias_ref.shape[2]
    d_model = x_ref.shape[1]
    dk = d_model // num_heads

    x = x_ref[...]                                # (Bb*T, D) f32
    enc_b = enc_ref[...].astype(bf16)             # (Bb*S, D) bf16

    # hoisted once (not re-broadcast per stage / per head)
    ln_g = ln_g_ref[...]
    ln_b = ln_b_ref[...]
    tbias = _rep_heads(tbias_ref[...].astype(f32), num_heads)    # (Bb*H, T, T)
    sbias = _rep_heads(sbias_ref[...].astype(f32), num_heads)    # (Bb*H, 1, S)

    # ---- self-attention + residual + norm1 (dropout = identity) ----
    qkv = jnp.dot(x.astype(bf16), wqkv_s_ref[...],
                  preferred_element_type=f32) + bqkv_s_ref[...]            # (Bb*T, 3D)
    sa = _attention(qkv[:, :d_model], qkv[:, d_model:2 * d_model],
                    qkv[:, 2 * d_model:], tbias,
                    wo_s_ref[...], bo_s_ref[...],
                    n_batch, t_len, t_len, num_heads, dk)
    x = _layer_norm(x + sa, ln_g[0:1, :], ln_b[0:1, :])

    # ---- cross-attention + residual + norm2 ----
    q_c = jnp.dot(x.astype(bf16), wq_c_ref[...],
                  preferred_element_type=f32) + bq_c_ref[...]              # (Bb*T, D)
    kv_c = jnp.dot(enc_b, wkv_c_ref[...],
                   preferred_element_type=f32) + bkv_c_ref[...]            # (Bb*S, 2D)
    ca = _attention(q_c, kv_c[:, :d_model], kv_c[:, d_model:], sbias,
                    wo_c_ref[...], bo_c_ref[...],
                    n_batch, t_len, s_len, num_heads, dk)
    x = _layer_norm(x + ca, ln_g[1:2, :], ln_b[1:2, :])

    # ---- feed forward + residual + norm3 ----
    h = jnp.maximum(jnp.dot(x.astype(bf16), w1_ref[...],
                            preferred_element_type=f32) + b1_ref[...], 0.0)
    ff = jnp.dot(h.astype(bf16), w2_ref[...],
                 preferred_element_type=f32) + b2_ref[...]
    x = _layer_norm(x + ff, ln_g[2:3, :], ln_b[2:3, :])

    out_ref[...] = x


# ---------------------------------------------------------------------------
# Wrapper: host-side weight packing + pallas_call
# ---------------------------------------------------------------------------
def transformer_decoder_layer(x, enc, tgt_mask, src_mask, params, num_heads,
                              block_b=None):
    B, T, D = x.shape
    S = enc.shape[1]
    F_ = params['w1'].shape[1]
    dk = D // num_heads
    bf16, f32 = jnp.bfloat16, jnp.float32

    if block_b is None:  # pack several batch elements into each grid step
        block_b = next(d for d in range(min(B, 8), 0, -1) if B % d == 0)
    n_blocks = B // block_b

    # ---- host-side weight packing (in production, pre-pack once) ----
    scale = 1.0 / math.sqrt(dk)                    # folded into Q projections
    ws, bs = params['w_self'], params['b_self']
    wc, bc = params['w_cross'], params['b_cross']
    w_self_qkv = jnp.concatenate([ws[0] * scale, ws[1], ws[2]], axis=1).astype(bf16)
    b_self_qkv = jnp.concatenate([bs[0] * scale, bs[1], bs[2]],
                                 axis=0).reshape(1, 3 * D).astype(f32)
    w_self_o = ws[3].astype(bf16)
    b_self_o = bs[3].reshape(1, D).astype(f32)
    w_cross_q = (wc[0] * scale).astype(bf16)
    b_cross_q = (bc[0] * scale).reshape(1, D).astype(f32)
    w_cross_kv = jnp.concatenate([wc[1], wc[2]], axis=1).astype(bf16)
    b_cross_kv = jnp.concatenate([bc[1], bc[2]], axis=0).reshape(1, 2 * D).astype(f32)
    w_cross_o = wc[3].astype(bf16)
    b_cross_o = bc[3].reshape(1, D).astype(f32)
    w1 = params['w1'].astype(bf16)
    b1 = params['b1'].reshape(1, F_).astype(f32)
    w2 = params['w2'].astype(bf16)
    b2 = params['b2'].reshape(1, D).astype(f32)
    ln_g = params['ln_g'].astype(f32)
    ln_b = params['ln_b'].astype(f32)

    # masks -> additive score biases (0 keep / -1e9 masked); bf16 halves mask DMA
    tgt_bias = ((tgt_mask.astype(f32) - 1.0) * 1e9).astype(bf16)      # (B, T, T)
    src_bias = ((src_mask.astype(f32) - 1.0) * 1e9).astype(bf16)      # (B, 1, S)

    # fold batch rows into the matmul M dimension (pure metadata reshape in HBM)
    x2d = x.reshape(B * T, D).astype(f32)
    enc2d = enc.reshape(B * S, D).astype(f32)

    # TODO(synk): for production d_model, pad D (and d_ff) to a multiple of 128 so
    # every vector op / store is lane-dense; skipped here to keep the small demo
    # shapes identical to the module definition.

    def rows_spec(rows, width):
        return pl.BlockSpec((rows, width), lambda b: (b, 0))

    def batch_spec(shape):
        nd = len(shape)
        return pl.BlockSpec((block_b,) + tuple(shape[1:]),
                            lambda b, _nd=nd: (b,) + (0,) * (_nd - 1))

    def shared_spec(shape):
        nd = len(shape)
        return pl.BlockSpec(tuple(shape), lambda b, _nd=nd: (0,) * _nd)

    in_specs = [
        rows_spec(block_b * T, D),                          # x (rows folded)
        rows_spec(block_b * S, D),                          # encoder out (rows folded)
        batch_spec((B, T, T)),                              # tgt additive bias
        batch_spec((B, 1, S)),                              # src additive bias
        shared_spec((D, 3 * D)), shared_spec((1, 3 * D)),   # self QKV (fused)
        shared_spec((D, D)), shared_spec((1, D)),           # self out-proj
        shared_spec((D, D)), shared_spec((1, D)),           # cross Q
        shared_spec((D, 2 * D)), shared_spec((1, 2 * D)),   # cross KV (fused)
        shared_spec((D, D)), shared_spec((1, D)),           # cross out-proj
        shared_spec((D, F_)), shared_spec((1, F_)),         # ffn linear1
        shared_spec((F_, D)), shared_spec((1, D)),          # ffn linear2
        shared_spec((3, D)), shared_spec((3, D)),           # layernorm gamma/beta
    ]

    out2d = pl.pallas_call(
        functools.partial(decoder_layer_kernel, num_heads),
        grid=(n_blocks,),
        in_specs=in_specs,
        out_specs=rows_spec(block_b * T, D),
        out_shape=jax.ShapeDtypeStruct((B * T, D), f32),
        input_output_aliases={0: 0},                # write result in place of x
        compiler_params=pltpu.CompilerParams(
            dimension_semantics=("parallel",),
            vmem_limit_bytes=32 * 1024 * 1024),
    )(x2d, enc2d, tgt_bias, src_bias,
      w_self_qkv, b_self_qkv, w_self_o, b_self_o,
      w_cross_q, b_cross_q, w_cross_kv, b_cross_kv, w_cross_o, b_cross_o,
      w1, b1, w2, b2, ln_g, ln_b)
    return out2d.reshape(B, T, D)


# ---------------------------------------------------------------------------
# Pure-JAX f32 reference (mirrors the PyTorch forward in eval mode)
# ---------------------------------------------------------------------------
def ref_forward(x, enc, tgt_mask, src_mask, params, num_heads):
    def mha(q_in, kv_in, w, b, mask):
        B, Tq, D = q_in.shape
        Tk = kv_in.shape[1]
        H, dk = num_heads, D // num_heads
        q = q_in @ w[0] + b[0]
        k = kv_in @ w[1] + b[1]
        v = kv_in @ w[2] + b[2]
        qh = q.reshape(B, Tq, H, dk).transpose(0, 2, 1, 3)
        kh = k.reshape(B, Tk, H, dk).transpose(0, 2, 1, 3)
        vh = v.reshape(B, Tk, H, dk).transpose(0, 2, 1, 3)
        scores = jnp.einsum('bhqd,bhkd->bhqk', qh, kh) / jnp.sqrt(jnp.float32(dk))
        scores = jnp.where(mask[:, None] == 0, -1e9, scores)
        p = jax.nn.softmax(scores, axis=-1)
        ctx = jnp.einsum('bhqk,bhkd->bhqd', p, vh).transpose(0, 2, 1, 3).reshape(B, Tq, D)
        return ctx @ w[3] + b[3]

    def ln(y, g, b):
        mu = y.mean(-1, keepdims=True)
        var = ((y - mu) ** 2).mean(-1, keepdims=True)
        return (y - mu) / jnp.sqrt(var + 1e-5) * g + b

    sa = mha(x, x, params['w_self'], params['b_self'], tgt_mask)
    x = ln(x + sa, params['ln_g'][0], params['ln_b'][0])
    ca = mha(x, enc, params['w_cross'], params['b_cross'], src_mask)
    x = ln(x + ca, params['ln_g'][1], params['ln_b'][1])
    h = jax.nn.relu(x @ params['w1'] + params['b1'])
    ff = h @ params['w2'] + params['b2']
    x = ln(x + ff, params['ln_g'][2], params['ln_b'][2])
    return x


if __name__ == "__main__":
    B, T, S, D, H, F_ = 2, 8, 8, 32, 4, 64
    key = jax.random.PRNGKey(0)
    keys = jax.random.split(key, 10)
    scale = 0.02
    params = {
        'w_self':  jax.random.normal(keys[0], (4, D, D), jnp.float32) * scale,
        'b_self':  jax.random.normal(keys[1], (4, D), jnp.float32) * scale,
        'w_cross': jax.random.normal(keys[2], (4, D, D), jnp.float32) * scale,
        'b_cross': jax.random.normal(keys[3], (4, D), jnp.float32) * scale,
        'w1':      jax.random.normal(keys[4], (D, F_), jnp.float32) * scale,
        'b1':      jax.random.normal(keys[5], (1, F_), jnp.float32) * scale,
        'w2':      jax.random.normal(keys[6], (F_, D), jnp.float32) * scale,
        'b2':      jax.random.normal(keys[7], (1, D), jnp.float32) * scale,
        'ln_g':    jnp.ones((3, D), jnp.float32),
        'ln_b':    jnp.zeros((3, D), jnp.float32),
    }
    x = jax.random.normal(keys[8], (B, T, D), jnp.float32)
    enc = jax.random.normal(keys[9], (B, S, D), jnp.float32)
    # causal target mask (T, T) per batch; src mask with the last position masked
    tgt_mask = jnp.broadcast_to(jnp.tril(jnp.ones((T, T), jnp.float32)), (B, T, T))
    src_mask = jnp.ones((B, 1, S), jnp.float32).at[:, :, -1].set(0.0)

    ref = ref_forward(x, enc, tgt_mask, src_mask, params, H)

    fwd = jax.jit(functools.partial(transformer_decoder_layer, num_heads=H))
    out = fwd(x, enc, tgt_mask, src_mask, params)
    out = jax.block_until_ready(out)

    # bf16 matmul operands + approx softmax reciprocal vs. f32 reference
    np.testing.assert_allclose(np.asarray(out), np.asarray(ref), atol=1e-2, rtol=1e-2)
    print("KERNEL_OK")
</pallas_src>

<mosaic_0001>
module attributes {stable_mosaic.version = 11 : i64} {
  func.func @decoder_layer_kernel(%arg0: i32, %arg1: memref<16x32xf32, #tpu.memory_space<vmem>>, %arg2: memref<16x32xf32, #tpu.memory_space<vmem>>, %arg3: memref<2x8x8xbf16, #tpu.memory_space<vmem>>, %arg4: memref<2x1x8xbf16, #tpu.memory_space<vmem>>, %arg5: memref<32x96xbf16, #tpu.memory_space<vmem>>, %arg6: memref<1x96xf32, #tpu.memory_space<vmem>>, %arg7: memref<32x32xbf16, #tpu.memory_space<vmem>>, %arg8: memref<1x32xf32, #tpu.memory_space<vmem>>, %arg9: memref<32x32xbf16, #tpu.memory_space<vmem>>, %arg10: memref<1x32xf32, #tpu.memory_space<vmem>>, %arg11: memref<32x64xbf16, #tpu.memory_space<vmem>>, %arg12: memref<1x64xf32, #tpu.memory_space<vmem>>, %arg13: memref<32x32xbf16, #tpu.memory_space<vmem>>, %arg14: memref<1x32xf32, #tpu.memory_space<vmem>>, %arg15: memref<32x64xbf16, #tpu.memory_space<vmem>>, %arg16: memref<1x64xf32, #tpu.memory_space<vmem>>, %arg17: memref<64x32xbf16, #tpu.memory_space<vmem>>, %arg18: memref<1x32xf32, #tpu.memory_space<vmem>>, %arg19: memref<3x32xf32, #tpu.memory_space<vmem>>, %arg20: memref<3x32xf32, #tpu.memory_space<vmem>>, %arg21: memref<16x32xf32, #tpu.memory_space<vmem>>) attributes {dimension_semantics = [#tpu.dimension_semantics<parallel>], iteration_bounds = array<i64: 1>, scalar_prefetch = 0 : i64, scratch_operands = 0 : i64, tpu.core_type = #tpu.core_type<tc>, window_params = [{transform_indices = @transform_0, window_bounds = array<i64: 16, 32>}, {transform_indices = @transform_1, window_bounds = array<i64: 16, 32>}, {transform_indices = @transform_2, window_bounds = array<i64: 2, 8, 8>}, {transform_indices = @transform_3, window_bounds = array<i64: 2, 1, 8>}, {pipeline_mode = #tpu.pipeline_mode<synchronous>, transform_indices = @transform_4, window_bounds = array<i64: 32, 96>}, {pipeline_mode = #tpu.pipeline_mode<synchronous>, transform_indices = @transform_5, window_bounds = array<i64: 1, 96>}, {pipeline_mode = #tpu.pipeline_mode<synchronous>, transform_indices = @transform_6, window_bounds = array<i64: 32, 32>}, {pipeline_mode = #tpu.pipeline_mode<synchronous>, transform_indices = @transform_7, window_bounds = array<i64: 1, 32>}, {pipeline_mode = #tpu.pipeline_mode<synchronous>, transform_indices = @transform_8, window_bounds = array<i64: 32, 32>}, {pipeline_mode = #tpu.pipeline_mode<synchronous>, transform_indices = @transform_9, window_bounds = array<i64: 1, 32>}, {pipeline_mode = #tpu.pipeline_mode<synchronous>, transform_indices = @transform_10, window_bounds = array<i64: 32, 64>}, {pipeline_mode = #tpu.pipeline_mode<synchronous>, transform_indices = @transform_11, window_bounds = array<i64: 1, 64>}, {pipeline_mode = #tpu.pipeline_mode<synchronous>, transform_indices = @transform_12, window_bounds = array<i64: 32, 32>}, {pipeline_mode = #tpu.pipeline_mode<synchronous>, transform_indices = @transform_13, window_bounds = array<i64: 1, 32>}, {pipeline_mode = #tpu.pipeline_mode<synchronous>, transform_indices = @transform_14, window_bounds = array<i64: 32, 64>}, {pipeline_mode = #tpu.pipeline_mode<synchronous>, transform_indices = @transform_15, window_bounds = array<i64: 1, 64>}, {pipeline_mode = #tpu.pipeline_mode<synchronous>, transform_indices = @transform_16, window_bounds = array<i64: 64, 32>}, {pipeline_mode = #tpu.pipeline_mode<synchronous>, transform_indices = @transform_17, window_bounds = array<i64: 1, 32>}, {pipeline_mode = #tpu.pipeline_mode<synchronous>, transform_indices = @transform_18, window_bounds = array<i64: 3, 32>}, {pipeline_mode = #tpu.pipeline_mode<synchronous>, transform_indices = @transform_19, window_bounds = array<i64: 3, 32>}, {transform_indices = @transform_20, window_bounds = array<i64: 16, 32>}]} {
    %c0 = arith.constant 0 : index
    %c0_0 = arith.constant 0 : index
    %0 = vector.load %arg1[%c0, %c0_0] : memref<16x32xf32, #tpu.memory_space<vmem>>, vector<16x32xf32>
    %c0_1 = arith.constant 0 : index
    %c0_2 = arith.constant 0 : index
    %1 = vector.load %arg2[%c0_1, %c0_2] : memref<16x32xf32, #tpu.memory_space<vmem>>, vector<16x32xf32>
    %2 = arith.truncf %1 : vector<16x32xf32> to vector<16x32xbf16>
    %c0_3 = arith.constant 0 : index
    %c0_4 = arith.constant 0 : index
    %3 = vector.load %arg19[%c0_3, %c0_4] : memref<3x32xf32, #tpu.memory_space<vmem>>, vector<3x32xf32>
    %c0_5 = arith.constant 0 : index
    %c0_6 = arith.constant 0 : index
    %4 = vector.load %arg20[%c0_5, %c0_6] : memref<3x32xf32, #tpu.memory_space<vmem>>, vector<3x32xf32>
    %c0_7 = arith.constant 0 : index
    %c0_8 = arith.constant 0 : index
    %c0_9 = arith.constant 0 : index
    %5 = vector.load %arg3[%c0_7, %c0_8, %c0_9] : memref<2x8x8xbf16, #tpu.memory_space<vmem>>, vector<2x8x8xbf16>
    %6 = arith.extf %5 : vector<2x8x8xbf16> to vector<2x8x8xf32>
    %7 = vector.extract_strided_slice %6 {offsets = [0, 0, 0], sizes = [1, 8, 8], strides = [1, 1, 1]} : vector<2x8x8xf32> to vector<1x8x8xf32>
    %8 = vector.extract_strided_slice %6 {offsets = [0, 0, 0], sizes = [1, 8, 8], strides = [1, 1, 1]} : vector<2x8x8xf32> to vector<1x8x8xf32>
    %9 = vector.extract_strided_slice %6 {offsets = [0, 0, 0], sizes = [1, 8, 8], strides = [1, 1, 1]} : vector<2x8x8xf32> to vector<1x8x8xf32>
    %10 = vector.extract_strided_slice %6 {offsets = [0, 0, 0], sizes = [1, 8, 8], strides = [1, 1, 1]} : vector<2x8x8xf32> to vector<1x8x8xf32>
    %11 = vector.extract_strided_slice %6 {offsets = [1, 0, 0], sizes = [1, 8, 8], strides = [1, 1, 1]} : vector<2x8x8xf32> to vector<1x8x8xf32>
    %12 = vector.extract_strided_slice %6 {offsets = [1, 0, 0], sizes = [1, 8, 8], strides = [1, 1, 1]} : vector<2x8x8xf32> to vector<1x8x8xf32>
    %13 = vector.extract_strided_slice %6 {offsets = [1, 0, 0], sizes = [1, 8, 8], strides = [1, 1, 1]} : vector<2x8x8xf32> to vector<1x8x8xf32>
    %14 = vector.extract_strided_slice %6 {offsets = [1, 0, 0], sizes = [1, 8, 8], strides = [1, 1, 1]} : vector<2x8x8xf32> to vector<1x8x8xf32>
    %15 = tpu.concatenate %7, %8, %9, %10, %11, %12, %13, %14 in 0 : vector<1x8x8xf32>, vector<1x8x8xf32>, vector<1x8x8xf32>, vector<1x8x8xf32>, vector<1x8x8xf32>, vector<1x8x8xf32>, vector<1x8x8xf32>, vector<1x8x8xf32> -> vector<8x8x8xf32>
    %c0_10 = arith.constant 0 : index
    %c0_11 = arith.constant 0 : index
    %c0_12 = arith.constant 0 : index
    %16 = vector.load %arg4[%c0_10, %c0_11, %c0_12] : memref<2x1x8xbf16, #tpu.memory_space<vmem>>, vector<2x1x8xbf16>
    %17 = arith.extf %16 : vector<2x1x8xbf16> to vector<2x1x8xf32>
    %18 = vector.extract_strided_slice %17 {offsets = [0, 0, 0], sizes = [1, 1, 8], strides = [1, 1, 1]} : vector<2x1x8xf32> to vector<1x1x8xf32>
    %19 = vector.extract_strided_slice %17 {offsets = [0, 0, 0], sizes = [1, 1, 8], strides = [1, 1, 1]} : vector<2x1x8xf32> to vector<1x1x8xf32>
    %20 = vector.extract_strided_slice %17 {offsets = [0, 0, 0], sizes = [1, 1, 8], strides = [1, 1, 1]} : vector<2x1x8xf32> to vector<1x1x8xf32>
    %21 = vector.extract_strided_slice %17 {offsets = [0, 0, 0], sizes = [1, 1, 8], strides = [1, 1, 1]} : vector<2x1x8xf32> to vector<1x1x8xf32>
    %22 = vector.extract_strided_slice %17 {offsets = [1, 0, 0], sizes = [1, 1, 8], strides = [1, 1, 1]} : vector<2x1x8xf32> to vector<1x1x8xf32>
    %23 = vector.extract_strided_slice %17 {offsets = [1, 0, 0], sizes = [1, 1, 8], strides = [1, 1, 1]} : vector<2x1x8xf32> to vector<1x1x8xf32>
    %24 = vector.extract_strided_slice %17 {offsets = [1, 0, 0], sizes = [1, 1, 8], strides = [1, 1, 1]} : vector<2x1x8xf32> to vector<1x1x8xf32>
    %25 = vector.extract_strided_slice %17 {offsets = [1, 0, 0], sizes = [1, 1, 8], strides = [1, 1, 1]} : vector<2x1x8xf32> to vector<1x1x8xf32>
    %26 = tpu.concatenate %18, %19, %20, %21, %22, %23, %24, %25 in 0 : vector<1x1x8xf32>, vector<1x1x8xf32>, vector<1x1x8xf32>, vector<1x1x8xf32>, vector<1x1x8xf32>, vector<1x1x8xf32>, vector<1x1x8xf32>, vector<1x1x8xf32> -> vector<8x1x8xf32>
    %27 = arith.truncf %0 : vector<16x32xf32> to vector<16x32xbf16>
    %c0_13 = arith.constant 0 : index
    %c0_14 = arith.constant 0 : index
    %28 = vector.load %arg5[%c0_13, %c0_14] : memref<32x96xbf16, #tpu.memory_space<vmem>>, vector<32x96xbf16>
    %cst = arith.constant dense<0.000000e+00> : vector<16x96xf32>
    %29 = tpu.matmul %27, %28, %cst {dimension_numbers = #tpu.dot_dimension_numbers<[1], [0], [0], [1], [0, 0, 1, 1], [], []>} : vector<16x32xbf16>, vector<32x96xbf16>, vector<16x96xf32> -> vector<16x96xf32>
    %c0_15 = arith.constant 0 : index
    %c0_16 = arith.constant 0 : index
    %30 = vector.load %arg6[%c0_15, %c0_16] : memref<1x96xf32, #tpu.memory_space<vmem>>, vector<1x96xf32>
    %31 = vector.broadcast %30 : vector<1x96xf32> to vector<16x96xf32>
    %32 = arith.addf %29, %31 : vector<16x96xf32>
    %33 = vector.extract_strided_slice %32 {offsets = [0, 0], sizes = [16, 32], strides = [1, 1]} : vector<16x96xf32> to vector<16x32xf32>
    %34 = vector.extract_strided_slice %32 {offsets = [0, 32], sizes = [16, 32], strides = [1, 1]} : vector<16x96xf32> to vector<16x32xf32>
    %35 = vector.extract_strided_slice %32 {offsets = [0, 64], sizes = [16, 32], strides = [1, 1]} : vector<16x96xf32> to vector<16x32xf32>
    %c0_17 = arith.constant 0 : index
    %c0_18 = arith.constant 0 : index
    %36 = vector.load %arg7[%c0_17, %c0_18] : memref<32x32xbf16, #tpu.memory_space<vmem>>, vector<32x32xbf16>
    %c0_19 = arith.constant 0 : index
    %c0_20 = arith.constant 0 : index
    %37 = vector.load %arg8[%c0_19, %c0_20] : memref<1x32xf32, #tpu.memory_space<vmem>>, vector<1x32xf32>
    %38 = vector.extract_strided_slice %33 {offsets = [0, 0], sizes = [8, 8], strides = [1, 1]} : vector<16x32xf32> to vector<8x8xf32>
    %39 = vector.extract_strided_slice %33 {offsets = [0, 8], sizes = [8, 8], strides = [1, 1]} : vector<16x32xf32> to vector<8x8xf32>
    %40 = vector.extract_strided_slice %33 {offsets = [0, 16], sizes = [8, 8], strides = [1, 1]} : vector<16x32xf32> to vector<8x8xf32>
    %41 = vector.extract_strided_slice %33 {offsets = [0, 24], sizes = [8, 8], strides = [1, 1]} : vector<16x32xf32> to vector<8x8xf32>
    %42 = vector.extract_strided_slice %33 {offsets = [8, 0], sizes = [8, 8], strides = [1, 1]} : vector<16x32xf32> to vector<8x8xf32>
    %43 = vector.extract_strided_slice %33 {offsets = [8, 8], sizes = [8, 8], strides = [1, 1]} : vector<16x32xf32> to vector<8x8xf32>
    %44 = vector.extract_strided_slice %33 {offsets = [8, 16], sizes = [8, 8], strides = [1, 1]} : vector<16x32xf32> to vector<8x8xf32>
    %45 = vector.extract_strided_slice %33 {offsets = [8, 24], sizes = [8, 8], strides = [1, 1]} : vector<16x32xf32> to vector<8x8xf32>
    %46 = vector.shape_cast %38 : vector<8x8xf32> to vector<1x8x8xf32>
    %47 = vector.shape_cast %39 : vector<8x8xf32> to vector<1x8x8xf32>
    %48 = vector.shape_cast %40 : vector<8x8xf32> to vector<1x8x8xf32>
    %49 = vector.shape_cast %41 : vector<8x8xf32> to vector<1x8x8xf32>
    %50 = vector.shape_cast %42 : vector<8x8xf32> to vector<1x8x8xf32>
    %51 = vector.shape_cast %43 : vector<8x8xf32> to vector<1x8x8xf32>
    %52 = vector.shape_cast %44 : vector<8x8xf32> to vector<1x8x8xf32>
    %53 = vector.shape_cast %45 : vector<8x8xf32> to vector<1x8x8xf32>
    %54 = tpu.concatenate %46, %47, %48, %49, %50, %51, %52, %53 in 0 : vector<1x8x8xf32>, vector<1x8x8xf32>, vector<1x8x8xf32>, vector<1x8x8xf32>, vector<1x8x8xf32>, vector<1x8x8xf32>, vector<1x8x8xf32>, vector<1x8x8xf32> -> vector<8x8x8xf32>
    %55 = arith.truncf %54 : vector<8x8x8xf32> to vector<8x8x8xbf16>
    %56 = vector.extract_strided_slice %34 {offsets = [0, 0], sizes = [8, 8], strides = [1, 1]} : vector<16x32xf32> to vector<8x8xf32>
    %57 = vector.extract_strided_slice %34 {offsets = [0, 8], sizes = [8, 8], strides = [1, 1]} : vector<16x32xf32> to vector<8x8xf32>
    %58 = vector.extract_strided_slice %34 {offsets = [0, 16], sizes = [8, 8], strides = [1, 1]} : vector<16x32xf32> to vector<8x8xf32>
    %59 = vector.extract_strided_slice %34 {offsets = [0, 24], sizes = [8, 8], strides = [1, 1]} : vector<16x32xf32> to vector<8x8xf32>
    %60 = vector.extract_strided_slice %34 {offsets = [8, 0], sizes = [8, 8], strides = [1, 1]} : vector<16x32xf32> to vector<8x8xf32>
    %61 = vector.extract_strided_slice %34 {offsets = [8, 8], sizes = [8, 8], strides = [1, 1]} : vector<16x32xf32> to vector<8x8xf32>
    %62 = vector.extract_strided_slice %34 {offsets = [8, 16], sizes = [8, 8], strides = [1, 1]} : vector<16x32xf32> to vector<8x8xf32>
    %63 = vector.extract_strided_slice %34 {offsets = [8, 24], sizes = [8, 8], strides = [1, 1]} : vector<16x32xf32> to vector<8x8xf32>
    %64 = vector.shape_cast %56 : vector<8x8xf32> to vector<1x8x8xf32>
    %65 = vector.shape_cast %57 : vector<8x8xf32> to vector<1x8x8xf32>
    %66 = vector.shape_cast %58 : vector<8x8xf32> to vector<1x8x8xf32>
    %67 = vector.shape_cast %59 : vector<8x8xf32> to vector<1x8x8xf32>
    %68 = vector.shape_cast %60 : vector<8x8xf32> to vector<1x8x8xf32>
    %69 = vector.shape_cast %61 : vector<8x8xf32> to vector<1x8x8xf32>
    %70 = vector.shape_cast %62 : vector<8x8xf32> to vector<1x8x8xf32>
    %71 = vector.shape_cast %63 : vector<8x8xf32> to vector<1x8x8xf32>
    %72 = tpu.concatenate %64, %65, %66, %67, %68, %69, %70, %71 in 0 : vector<1x8x8xf32>, vector<1x8x8xf32>, vector<1x8x8xf32>, vector<1x8x8xf32>, vector<1x8x8xf32>, vector<1x8x8xf32>, vector<1x8x8xf32>, vector<1x8x8xf32> -> vector<8x8x8xf32>
    %73 = arith.truncf %72 : vector<8x8x8xf32> to vector<8x8x8xbf16>
    %74 = vector.extract_strided_slice %35 {offsets = [0, 0], sizes = [8, 8], strides = [1, 1]} : vector<16x32xf32> to vector<8x8xf32>
    %75 = vector.extract_strided_slice %35 {offsets = [0, 8], sizes = [8, 8], strides = [1, 1]} : vector<16x32xf32> to vector<8x8xf32>
    %76 = vector.extract_strided_slice %35 {offsets = [0, 16], sizes = [8, 8], strides = [1, 1]} : vector<16x32xf32> to vector<8x8xf32>
    %77 = vector.extract_strided_slice %35 {offsets = [0, 24], sizes = [8, 8], strides = [1, 1]} : vector<16x32xf32> to vector<8x8xf32>
    %78 = vector.extract_strided_slice %35 {offsets = [8, 0], sizes = [8, 8], strides = [1, 1]} : vector<16x32xf32> to vector<8x8xf32>
    %79 = vector.extract_strided_slice %35 {offsets = [8, 8], sizes = [8, 8], strides = [1, 1]} : vector<16x32xf32> to vector<8x8xf32>
    %80 = vector.extract_strided_slice %35 {offsets = [8, 16], sizes = [8, 8], strides = [1, 1]} : vector<16x32xf32> to vector<8x8xf32>
    %81 = vector.extract_strided_slice %35 {offsets = [8, 24], sizes = [8, 8], strides = [1, 1]} : vector<16x32xf32> to vector<8x8xf32>
    %82 = vector.shape_cast %74 : vector<8x8xf32> to vector<1x8x8xf32>
    %83 = vector.shape_cast %75 : vector<8x8xf32> to vector<1x8x8xf32>
    %84 = vector.shape_cast %76 : vector<8x8xf32> to vector<1x8x8xf32>
    %85 = vector.shape_cast %77 : vector<8x8xf32> to vector<1x8x8xf32>
    %86 = vector.shape_cast %78 : vector<8x8xf32> to vector<1x8x8xf32>
    %87 = vector.shape_cast %79 : vector<8x8xf32> to vector<1x8x8xf32>
    %88 = vector.shape_cast %80 : vector<8x8xf32> to vector<1x8x8xf32>
    %89 = vector.shape_cast %81 : vector<8x8xf32> to vector<1x8x8xf32>
    %90 = tpu.concatenate %82, %83, %84, %85, %86, %87, %88, %89 in 0 : vector<1x8x8xf32>, vector<1x8x8xf32>, vector<1x8x8xf32>, vector<1x8x8xf32>, vector<1x8x8xf32>, vector<1x8x8xf32>, vector<1x8x8xf32>, vector<1x8x8xf32> -> vector<8x8x8xf32>
    %91 = arith.truncf %90 : vector<8x8x8xf32> to vector<8x8x8xbf16>
    "tpu.trace_start"() <{level = 10 : i32, message = "nqd,nkd->nqk"}> : () -> ()
    %cst_21 = arith.constant dense<0.000000e+00> : vector<8x8x8xf32>
    %92 = tpu.matmul %55, %73, %cst_21 {dimension_numbers = #tpu.dot_dimension_numbers<[2], [2], [1], [1], [0, 0, 0, 1, 1, 1], [0], [0]>} : vector<8x8x8xbf16>, vector<8x8x8xbf16>, vector<8x8x8xf32> -> vector<8x8x8xf32>
    "tpu.trace_stop"() : () -> ()
    %93 = arith.addf %92, %15 : vector<8x8x8xf32>
    %cst_22 = arith.constant dense<0xFF800000> : vector<8x8xf32>
    %94 = vector.multi_reduction <maximumf>, %93, %cst_22 [2] : vector<8x8x8xf32> to vector<8x8xf32>
    %95 = vector.shape_cast %94 : vector<8x8xf32> to vector<8x8x1xf32>
    %96 = vector.broadcast %95 : vector<8x8x1xf32> to vector<8x8x8xf32>
    %97 = arith.subf %93, %96 : vector<8x8x8xf32>
    %98 = math.exp %97 : vector<8x8x8xf32>
    %cst_23 = arith.constant dense<0.000000e+00> : vector<8x8xf32>
    %99 = vector.multi_reduction <add>, %98, %cst_23 [2] : vector<8x8x8xf32> to vector<8x8xf32>
    %100 = vector.shape_cast %99 : vector<8x8xf32> to vector<8x8x1xf32>
    %101 = tpu.reciprocal %100 {approx = true} : vector<8x8x1xf32> -> vector<8x8x1xf32>
    %102 = vector.broadcast %101 : vector<8x8x1xf32> to vector<8x8x8xf32>
    %103 = arith.mulf %98, %102 : vector<8x8x8xf32>
    %104 = arith.truncf %103 : vector<8x8x8xf32> to vector<8x8x8xbf16>
    "tpu.trace_start"() <{level = 10 : i32, message = "nqk,nkd->nqd"}> : () -> ()
    %cst_24 = arith.constant dense<0.000000e+00> : vector<8x8x8xf32>
    %105 = tpu.matmul %104, %91, %cst_24 {dimension_numbers = #tpu.dot_dimension_numbers<[2], [1], [1], [2], [0, 0, 0, 1, 1, 2], [0], [0]>} : vector<8x8x8xbf16>, vector<8x8x8xbf16>, vector<8x8x8xf32> -> vector<8x8x8xf32>
    "tpu.trace_stop"() : () -> ()
    %106 = vector.extract_strided_slice %105 {offsets = [0, 0, 0], sizes = [1, 8, 8], strides = [1, 1, 1]} : vector<8x8x8xf32> to vector<1x8x8xf32>
    %107 = vector.shape_cast %106 : vector<1x8x8xf32> to vector<8x8xf32>
    %108 = vector.extract_strided_slice %105 {offsets = [1, 0, 0], sizes = [1, 8, 8], strides = [1, 1, 1]} : vector<8x8x8xf32> to vector<1x8x8xf32>
    %109 = vector.shape_cast %108 : vector<1x8x8xf32> to vector<8x8xf32>
    %110 = vector.extract_strided_slice %105 {offsets = [2, 0, 0], sizes = [1, 8, 8], strides = [1, 1, 1]} : vector<8x8x8xf32> to vector<1x8x8xf32>
    %111 = vector.shape_cast %110 : vector<1x8x8xf32> to vector<8x8xf32>
    %112 = vector.extract_strided_slice %105 {offsets = [3, 0, 0], sizes = [1, 8, 8], strides = [1, 1, 1]} : vector<8x8x8xf32> to vector<1x8x8xf32>
    %113 = vector.shape_cast %112 : vector<1x8x8xf32> to vector<8x8xf32>
    %114 = tpu.concatenate %107, %109, %111, %113 in 1 : vector<8x8xf32>, vector<8x8xf32>, vector<8x8xf32>, vector<8x8xf32> -> vector<8x32xf32>
    %115 = vector.extract_strided_slice %105 {offsets = [4, 0, 0], sizes = [1, 8, 8], strides = [1, 1, 1]} : vector<8x8x8xf32> to vector<1x8x8xf32>
    %116 = vector.shape_cast %115 : vector<1x8x8xf32> to vector<8x8xf32>
    %117 = vector.extract_strided_slice %105 {offsets = [5, 0, 0], sizes = [1, 8, 8], strides = [1, 1, 1]} : vector<8x8x8xf32> to vector<1x8x8xf32>
    %118 = vector.shape_cast %117 : vector<1x8x8xf32> to vector<8x8xf32>
    %119 = vector.extract_strided_slice %105 {offsets = [6, 0, 0], sizes = [1, 8, 8], strides = [1, 1, 1]} : vector<8x8x8xf32> to vector<1x8x8xf32>
    %120 = vector.shape_cast %119 : vector<1x8x8xf32> to vector<8x8xf32>
    %121 = vector.extract_strided_slice %105 {offsets = [7, 0, 0], sizes = [1, 8, 8], strides = [1, 1, 1]} : vector<8x8x8xf32> to vector<1x8x8xf32>
    %122 = vector.shape_cast %121 : vector<1x8x8xf32> to vector<8x8xf32>
    %123 = tpu.concatenate %116, %118, %120, %122 in 1 : vector<8x8xf32>, vector<8x8xf32>, vector<8x8xf32>, vector<8x8xf32> -> vector<8x32xf32>
    %124 = tpu.concatenate %114, %123 in 0 : vector<8x32xf32>, vector<8x32xf32> -> vector<16x32xf32>
    %125 = arith.truncf %124 : vector<16x32xf32> to vector<16x32xbf16>
    %cst_25 = arith.constant dense<0.000000e+00> : vector<16x32xf32>
    %126 = tpu.matmul %125, %36, %cst_25 {dimension_numbers = #tpu.dot_dimension_numbers<[1], [0], [0], [1], [0, 0, 1, 1], [], []>} : vector<16x32xbf16>, vector<32x32xbf16>, vector<16x32xf32> -> vector<16x32xf32>
    %127 = vector.broadcast %37 : vector<1x32xf32> to vector<16x32xf32>
    %128 = arith.addf %126, %127 : vector<16x32xf32>
    %129 = arith.addf %0, %128 : vector<16x32xf32>
    %130 = vector.extract_strided_slice %3 {offsets = [0, 0], sizes = [1, 32], strides = [1, 1]} : vector<3x32xf32> to vector<1x32xf32>
    %131 = vector.extract_strided_slice %4 {offsets = [0, 0], sizes = [1, 32], strides = [1, 1]} : vector<3x32xf32> to vector<1x32xf32>
    %cst_26 = arith.constant dense<0.000000e+00> : vector<16xf32>
    %132 = vector.multi_reduction <add>, %129, %cst_26 [1] : vector<16x32xf32> to vector<16xf32>
    %133 = vector.shape_cast %132 : vector<16xf32> to vector<16x1xf32>
    %cst_27 = arith.constant 3.200000e+01 : f32
    %134 = vector.broadcast %cst_27 : f32 to vector<16x1xf32>
    %135 = arith.divf %133, %134 : vector<16x1xf32>
    %136 = vector.broadcast %135 : vector<16x1xf32> to vector<16x32xf32>
    %137 = arith.subf %129, %136 : vector<16x32xf32>
    %138 = arith.mulf %137, %137 : vector<16x32xf32>
    %cst_28 = arith.constant dense<0.000000e+00> : vector<16xf32>
    %139 = vector.multi_reduction <add>, %138, %cst_28 [1] : vector<16x32xf32> to vector<16xf32>
    %140 = vector.shape_cast %139 : vector<16xf32> to vector<16x1xf32>
    %cst_29 = arith.constant 3.200000e+01 : f32
    %141 = vector.broadcast %cst_29 : f32 to vector<16x1xf32>
    %142 = arith.divf %140, %141 : vector<16x1xf32>
    %cst_30 = arith.constant 9.99999974E-6 : f32
    %143 = vector.broadcast %cst_30 : f32 to vector<16x1xf32>
    %144 = arith.addf %142, %143 : vector<16x1xf32>
    %145 = math.rsqrt %144 : vector<16x1xf32>
    %146 = vector.broadcast %145 : vector<16x1xf32> to vector<16x32xf32>
    %147 = arith.mulf %137, %146 : vector<16x32xf32>
    %148 = vector.broadcast %130 : vector<1x32xf32> to vector<16x32xf32>
    %149 = arith.mulf %147, %148 : vector<16x32xf32>
    %150 = vector.broadcast %131 : vector<1x32xf32> to vector<16x32xf32>
    %151 = arith.addf %149, %150 : vector<16x32xf32>
    %152 = arith.truncf %151 : vector<16x32xf32> to vector<16x32xbf16>
    %c0_31 = arith.constant 0 : index
    %c0_32 = arith.constant 0 : index
    %153 = vector.load %arg9[%c0_31, %c0_32] : memref<32x32xbf16, #tpu.memory_space<vmem>>, vector<32x32xbf16>
    %cst_33 = arith.constant dense<0.000000e+00> : vector<16x32xf32>
    %154 = tpu.matmul %152, %153, %cst_33 {dimension_numbers = #tpu.dot_dimension_numbers<[1], [0], [0], [1], [0, 0, 1, 1], [], []>} : vector<16x32xbf16>, vector<32x32xbf16>, vector<16x32xf32> -> vector<16x32xf32>
    %c0_34 = arith.constant 0 : index
    %c0_35 = arith.constant 0 : index
    %155 = vector.load %arg10[%c0_34, %c0_35] : memref<1x32xf32, #tpu.memory_space<vmem>>, vector<1x32xf32>
    %156 = vector.broadcast %155 : vector<1x32xf32> to vector<16x32xf32>
    %157 = arith.addf %154, %156 : vector<16x32xf32>
    %c0_36 = arith.constant 0 : index
    %c0_37 = arith.constant 0 : index
    %158 = vector.load %arg11[%c0_36, %c0_37] : memref<32x64xbf16, #tpu.memory_space<vmem>>, vector<32x64xbf16>
    %cst_38 = arith.constant dense<0.000000e+00> : vector<16x64xf32>
    %159 = tpu.matmul %2, %158, %cst_38 {dimension_numbers = #tpu.dot_dimension_numbers<[1], [0], [0], [1], [0, 0, 1, 1], [], []>} : vector<16x32xbf16>, vector<32x64xbf16>, vector<16x64xf32> -> vector<16x64xf32>
    %c0_39 = arith.constant 0 : index
    %c0_40 = arith.constant 0 : index
    %160 = vector.load %arg12[%c0_39, %c0_40] : memref<1x64xf32, #tpu.memory_space<vmem>>, vector<1x64xf32>
    %161 = vector.broadcast %160 : vector<1x64xf32> to vector<16x64xf32>
    %162 = arith.addf %159, %161 : vector<16x64xf32>
    %163 = vector.extract_strided_slice %162 {offsets = [0, 0], sizes = [16, 32], strides = [1, 1]} : vector<16x64xf32> to vector<16x32xf32>
    %164 = vector.extract_strided_slice %162 {offsets = [0, 32], sizes = [16, 32], strides = [1, 1]} : vector<16x64xf32> to vector<16x32xf32>
    %c0_41 = arith.constant 0 : index
    %c0_42 = arith.constant 0 : index
    %165 = vector.load %arg13[%c0_41, %c0_42] : memref<32x32xbf16, #tpu.memory_space<vmem>>, vector<32x32xbf16>
    %c0_43 = arith.constant 0 : index
    %c0_44 = arith.constant 0 : index
    %166 = vector.load %arg14[%c0_43, %c0_44] : memref<1x32xf32, #tpu.memory_space<vmem>>, vector<1x32xf32>
    %167 = vector.extract_strided_slice %157 {offsets = [0, 0], sizes = [8, 8], strides = [1, 1]} : vector<16x32xf32> to vector<8x8xf32>
    %168 = vector.extract_strided_slice %157 {offsets = [0, 8], sizes = [8, 8], strides = [1, 1]} : vector<16x32xf32> to vector<8x8xf32>
    %169 = vector.extract_strided_slice %157 {offsets = [0, 16], sizes = [8, 8], strides = [1, 1]} : vector<16x32xf32> to vector<8x8xf32>
    %170 = vector.extract_strided_slice %157 {offsets = [0, 24], sizes = [8, 8], strides = [1, 1]} : vector<16x32xf32> to vector<8x8xf32>
    %171 = vector.extract_strided_slice %157 {offsets = [8, 0], sizes = [8, 8], strides = [1, 1]} : vector<16x32xf32> to vector<8x8xf32>
    %172 = vector.extract_strided_slice %157 {offsets = [8, 8], sizes = [8, 8], strides = [1, 1]} : vector<16x32xf32> to vector<8x8xf32>
    %173 = vector.extract_strided_slice %157 {offsets = [8, 16], sizes = [8, 8], strides = [1, 1]} : vector<16x32xf32> to vector<8x8xf32>
    %174 = vector.extract_strided_slice %157 {offsets = [8, 24], sizes = [8, 8], strides = [1, 1]} : vector<16x32xf32> to vector<8x8xf32>
    %175 = vector.shape_cast %167 : vector<8x8xf32> to vector<1x8x8xf32>
    %176 = vector.shape_cast %168 : vector<8x8xf32> to vector<1x8x8xf32>
    %177 = vector.shape_cast %169 : vector<8x8xf32> to vector<1x8x8xf32>
    %178 = vector.shape_cast %170 : vector<8x8xf32> to vector<1x8x8xf32>
    %179 = vector.shape_cast %171 : vector<8x8xf32> to vector<1x8x8xf32>
    %180 = vector.shape_cast %172 : vector<8x8xf32> to vector<1x8x8xf32>
    %181 = vector.shape_cast %173 : vector<8x8xf32> to vector<1x8x8xf32>
    %182 = vector.shape_cast %174 : vector<8x8xf32> to vector<1x8x8xf32>
    %183 = tpu.concatenate %175, %176, %177, %178, %179, %180, %181, %182 in 0 : vector<1x8x8xf32>, vector<1x8x8xf32>, vector<1x8x8xf32>, vector<1x8x8xf32>, vector<1x8x8xf32>, vector<1x8x8xf32>, vector<1x8x8xf32>, vector<1x8x8xf32> -> vector<8x8x8xf32>
    %184 = arith.truncf %183 : vector<8x8x8xf32> to vector<8x8x8xbf16>
    %185 = vector.extract_strided_slice %163 {offsets = [0, 0], sizes = [8, 8], strides = [1, 1]} : vector<16x32xf32> to vector<8x8xf32>
    %186 = vector.extract_strided_slice %163 {offsets = [0, 8], sizes = [8, 8], strides = [1, 1]} : vector<16x32xf32> to vector<8x8xf32>
    %187 = vector.extract_strided_slice %163 {offsets = [0, 16], sizes = [8, 8], strides = [1, 1]} : vector<16x32xf32> to vector<8x8xf32>
    %188 = vector.extract_strided_slice %163 {offsets = [0, 24], sizes = [8, 8], strides = [1, 1]} : vector<16x32xf32> to vector<8x8xf32>
    %189 = vector.extract_strided_slice %163 {offsets = [8, 0], sizes = [8, 8], strides = [1, 1]} : vector<16x32xf32> to vector<8x8xf32>
    %190 = vector.extract_strided_slice %163 {offsets = [8, 8], sizes = [8, 8], strides = [1, 1]} : vector<16x32xf32> to vector<8x8xf32>
    %191 = vector.extract_strided_slice %163 {offsets = [8, 16], sizes = [8, 8], strides = [1, 1]} : vector<16x32xf32> to vector<8x8xf32>
    %192 = vector.extract_strided_slice %163 {offsets = [8, 24], sizes = [8, 8], strides = [1, 1]} : vector<16x32xf32> to vector<8x8xf32>
    %193 = vector.shape_cast %185 : vector<8x8xf32> to vector<1x8x8xf32>
    %194 = vector.shape_cast %186 : vector<8x8xf32> to vector<1x8x8xf32>
    %195 = vector.shape_cast %187 : vector<8x8xf32> to vector<1x8x8xf32>
    %196 = vector.shape_cast %188 : vector<8x8xf32> to vector<1x8x8xf32>
    %197 = vector.shape_cast %189 : vector<8x8xf32> to vector<1x8x8xf32>
    %198 = vector.shape_cast %190 : vector<8x8xf32> to vector<1x8x8xf32>
    %199 = vector.shape_cast %191 : vector<8x8xf32> to vector<1x8x8xf32>
    %200 = vector.shape_cast %192 : vector<8x8xf32> to vector<1x8x8xf32>
    %201 = tpu.concatenate %193, %194, %195, %196, %197, %198, %199, %200 in 0 : vector<1x8x8xf32>, vector<1x8x8xf32>, vector<1x8x8xf32>, vector<1x8x8xf32>, vector<1x8x8xf32>, vector<1x8x8xf32>, vector<1x8x8xf32>, vector<1x8x8xf32> -> vector<8x8x8xf32>
    %202 = arith.truncf %201 : vector<8x8x8xf32> to vector<8x8x8xbf16>
    %203 = vector.extract_strided_slice %164 {offsets = [0, 0], sizes = [8, 8], strides = [1, 1]} : vector<16x32xf32> to vector<8x8xf32>
    %204 = vector.extract_strided_slice %164 {offsets = [0, 8], sizes = [8, 8], strides = [1, 1]} : vector<16x32xf32> to vector<8x8xf32>
    %205 = vector.extract_strided_slice %164 {offsets = [0, 16], sizes = [8, 8], strides = [1, 1]} : vector<16x32xf32> to vector<8x8xf32>
    %206 = vector.extract_strided_slice %164 {offsets = [0, 24], sizes = [8, 8], strides = [1, 1]} : vector<16x32xf32> to vector<8x8xf32>
    %207 = vector.extract_strided_slice %164 {offsets = [8, 0], sizes = [8, 8], strides = [1, 1]} : vector<16x32xf32> to vector<8x8xf32>
    %208 = vector.extract_strided_slice %164 {offsets = [8, 8], sizes = [8, 8], strides = [1, 1]} : vector<16x32xf32> to vector<8x8xf32>
    %209 = vector.extract_strided_slice %164 {offsets = [8, 16], sizes = [8, 8], strides = [1, 1]} : vector<16x32xf32> to vector<8x8xf32>
    %210 = vector.extract_strided_slice %164 {offsets = [8, 24], sizes = [8, 8], strides = [1, 1]} : vector<16x32xf32> to vector<8x8xf32>
    %211 = vector.shape_cast %203 : vector<8x8xf32> to vector<1x8x8xf32>
    %212 = vector.shape_cast %204 : vector<8x8xf32> to vector<1x8x8xf32>
    %213 = vector.shape_cast %205 : vector<8x8xf32> to vector<1x8x8xf32>
    %214 = vector.shape_cast %206 : vector<8x8xf32> to vector<1x8x8xf32>
    %215 = vector.shape_cast %207 : vector<8x8xf32> to vector<1x8x8xf32>
    %216 = vector.shape_cast %208 : vector<8x8xf32> to vector<1x8x8xf32>
    %217 = vector.shape_cast %209 : vector<8x8xf32> to vector<1x8x8xf32>
    %218 = vector.shape_cast %210 : vector<8x8xf32> to vector<1x8x8xf32>
    %219 = tpu.concatenate %211, %212, %213, %214, %215, %216, %217, %218 in 0 : vector<1x8x8xf32>, vector<1x8x8xf32>, vector<1x8x8xf32>, vector<1x8x8xf32>, vector<1x8x8xf32>, vector<1x8x8xf32>, vector<1x8x8xf32>, vector<1x8x8xf32> -> vector<8x8x8xf32>
    %220 = arith.truncf %219 : vector<8x8x8xf32> to vector<8x8x8xbf16>
    "tpu.trace_start"() <{level = 10 : i32, message = "nqd,nkd->nqk"}> : () -> ()
    %cst_45 = arith.constant dense<0.000000e+00> : vector<8x8x8xf32>
    %221 = tpu.matmul %184, %202, %cst_45 {dimension_numbers = #tpu.dot_dimension_numbers<[2], [2], [1], [1], [0, 0, 0, 1, 1, 1], [0], [0]>} : vector<8x8x8xbf16>, vector<8x8x8xbf16>, vector<8x8x8xf32> -> vector<8x8x8xf32>
    "tpu.trace_stop"() : () -> ()
    %222 = vector.broadcast %26 : vector<8x1x8xf32> to vector<8x8x8xf32>
    %223 = arith.addf %221, %222 : vector<8x8x8xf32>
    %cst_46 = arith.constant dense<0xFF800000> : vector<8x8xf32>
    %224 = vector.multi_reduction <maximumf>, %223, %cst_46 [2] : vector<8x8x8xf32> to vector<8x8xf32>
    %225 = vector.shape_cast %224 : vector<8x8xf32> to vector<8x8x1xf32>
    %226 = vector.broadcast %225 : vector<8x8x1xf32> to vector<8x8x8xf32>
    %227 = arith.subf %223, %226 : vector<8x8x8xf32>
    %228 = math.exp %227 : vector<8x8x8xf32>
    %cst_47 = arith.constant dense<0.000000e+00> : vector<8x8xf32>
    %229 = vector.multi_reduction <add>, %228, %cst_47 [2] : vector<8x8x8xf32> to vector<8x8xf32>
    %230 = vector.shape_cast %229 : vector<8x8xf32> to vector<8x8x1xf32>
    %231 = tpu.reciprocal %230 {approx = true} : vector<8x8x1xf32> -> vector<8x8x1xf32>
    %232 = vector.broadcast %231 : vector<8x8x1xf32> to vector<8x8x8xf32>
    %233 = arith.mulf %228, %232 : vector<8x8x8xf32>
    %234 = arith.truncf %233 : vector<8x8x8xf32> to vector<8x8x8xbf16>
    "tpu.trace_start"() <{level = 10 : i32, message = "nqk,nkd->nqd"}> : () -> ()
    %cst_48 = arith.constant dense<0.000000e+00> : vector<8x8x8xf32>
    %235 = tpu.matmul %234, %220, %cst_48 {dimension_numbers = #tpu.dot_dimension_numbers<[2], [1], [1], [2], [0, 0, 0, 1, 1, 2], [0], [0]>} : vector<8x8x8xbf16>, vector<8x8x8xbf16>, vector<8x8x8xf32> -> vector<8x8x8xf32>
    "tpu.trace_stop"() : () -> ()
    %236 = vector.extract_strided_slice %235 {offsets = [0, 0, 0], sizes = [1, 8, 8], strides = [1, 1, 1]} : vector<8x8x8xf32> to vector<1x8x8xf32>
    %237 = vector.shape_cast %236 : vector<1x8x8xf32> to vector<8x8xf32>
    %238 = vector.extract_strided_slice %235 {offsets = [1, 0, 0], sizes = [1, 8, 8], strides = [1, 1, 1]} : vector<8x8x8xf32> to vector<1x8x8xf32>
    %239 = vector.shape_cast %238 : vector<1x8x8xf32> to vector<8x8xf32>
    %240 = vector.extract_strided_slice %235 {offsets = [2, 0, 0], sizes = [1, 8, 8], strides = [1, 1, 1]} : vector<8x8x8xf32> to vector<1x8x8xf32>
    %241 = vector.shape_cast %240 : vector<1x8x8xf32> to vector<8x8xf32>
    %242 = vector.extract_strided_slice %235 {offsets = [3, 0, 0], sizes = [1, 8, 8], strides = [1, 1, 1]} : vector<8x8x8xf32> to vector<1x8x8xf32>
    %243 = vector.shape_cast %242 : vector<1x8x8xf32> to vector<8x8xf32>
    %244 = tpu.concatenate %237, %239, %241, %243 in 1 : vector<8x8xf32>, vector<8x8xf32>, vector<8x8xf32>, vector<8x8xf32> -> vector<8x32xf32>
    %245 = vector.extract_strided_slice %235 {offsets = [4, 0, 0], sizes = [1, 8, 8], strides = [1, 1, 1]} : vector<8x8x8xf32> to vector<1x8x8xf32>
    %246 = vector.shape_cast %245 : vector<1x8x8xf32> to vector<8x8xf32>
    %247 = vector.extract_strided_slice %235 {offsets = [5, 0, 0], sizes = [1, 8, 8], strides = [1, 1, 1]} : vector<8x8x8xf32> to vector<1x8x8xf32>
    %248 = vector.shape_cast %247 : vector<1x8x8xf32> to vector<8x8xf32>
    %249 = vector.extract_strided_slice %235 {offsets = [6, 0, 0], sizes = [1, 8, 8], strides = [1, 1, 1]} : vector<8x8x8xf32> to vector<1x8x8xf32>
    %250 = vector.shape_cast %249 : vector<1x8x8xf32> to vector<8x8xf32>
    %251 = vector.extract_strided_slice %235 {offsets = [7, 0, 0], sizes = [1, 8, 8], strides = [1, 1, 1]} : vector<8x8x8xf32> to vector<1x8x8xf32>
    %252 = vector.shape_cast %251 : vector<1x8x8xf32> to vector<8x8xf32>
    %253 = tpu.concatenate %246, %248, %250, %252 in 1 : vector<8x8xf32>, vector<8x8xf32>, vector<8x8xf32>, vector<8x8xf32> -> vector<8x32xf32>
    %254 = tpu.concatenate %244, %253 in 0 : vector<8x32xf32>, vector<8x32xf32> -> vector<16x32xf32>
    %255 = arith.truncf %254 : vector<16x32xf32> to vector<16x32xbf16>
    %cst_49 = arith.constant dense<0.000000e+00> : vector<16x32xf32>
    %256 = tpu.matmul %255, %165, %cst_49 {dimension_numbers = #tpu.dot_dimension_numbers<[1], [0], [0], [1], [0, 0, 1, 1], [], []>} : vector<16x32xbf16>, vector<32x32xbf16>, vector<16x32xf32> -> vector<16x32xf32>
    %257 = vector.broadcast %166 : vector<1x32xf32> to vector<16x32xf32>
    %258 = arith.addf %256, %257 : vector<16x32xf32>
    %259 = arith.addf %151, %258 : vector<16x32xf32>
    %260 = vector.extract_strided_slice %3 {offsets = [1, 0], sizes = [1, 32], strides = [1, 1]} : vector<3x32xf32> to vector<1x32xf32>
    %261 = vector.extract_strided_slice %4 {offsets = [1, 0], sizes = [1, 32], strides = [1, 1]} : vector<3x32xf32> to vector<1x32xf32>
    %cst_50 = arith.constant dense<0.000000e+00> : vector<16xf32>
    %262 = vector.multi_reduction <add>, %259, %cst_50 [1] : vector<16x32xf32> to vector<16xf32>
    %263 = vector.shape_cast %262 : vector<16xf32> to vector<16x1xf32>
    %cst_51 = arith.constant 3.200000e+01 : f32
    %264 = vector.broadcast %cst_51 : f32 to vector<16x1xf32>
    %265 = arith.divf %263, %264 : vector<16x1xf32>
    %266 = vector.broadcast %265 : vector<16x1xf32> to vector<16x32xf32>
    %267 = arith.subf %259, %266 : vector<16x32xf32>
    %268 = arith.mulf %267, %267 : vector<16x32xf32>
    %cst_52 = arith.constant dense<0.000000e+00> : vector<16xf32>
    %269 = vector.multi_reduction <add>, %268, %cst_52 [1] : vector<16x32xf32> to vector<16xf32>
    %270 = vector.shape_cast %269 : vector<16xf32> to vector<16x1xf32>
    %cst_53 = arith.constant 3.200000e+01 : f32
    %271 = vector.broadcast %cst_53 : f32 to vector<16x1xf32>
    %272 = arith.divf %270, %271 : vector<16x1xf32>
    %cst_54 = arith.constant 9.99999974E-6 : f32
    %273 = vector.broadcast %cst_54 : f32 to vector<16x1xf32>
    %274 = arith.addf %272, %273 : vector<16x1xf32>
    %275 = math.rsqrt %274 : vector<16x1xf32>
    %276 = vector.broadcast %275 : vector<16x1xf32> to vector<16x32xf32>
    %277 = arith.mulf %267, %276 : vector<16x32xf32>
    %278 = vector.broadcast %260 : vector<1x32xf32> to vector<16x32xf32>
    %279 = arith.mulf %277, %278 : vector<16x32xf32>
    %280 = vector.broadcast %261 : vector<1x32xf32> to vector<16x32xf32>
    %281 = arith.addf %279, %280 : vector<16x32xf32>
    %282 = arith.truncf %281 : vector<16x32xf32> to vector<16x32xbf16>
    %c0_55 = arith.constant 0 : index
    %c0_56 = arith.constant 0 : index
    %283 = vector.load %arg15[%c0_55, %c0_56] : memref<32x64xbf16, #tpu.memory_space<vmem>>, vector<32x64xbf16>
    %cst_57 = arith.constant dense<0.000000e+00> : vector<16x64xf32>
    %284 = tpu.matmul %282, %283, %cst_57 {dimension_numbers = #tpu.dot_dimension_numbers<[1], [0], [0], [1], [0, 0, 1, 1], [], []>} : vector<16x32xbf16>, vector<32x64xbf16>, vector<16x64xf32> -> vector<16x64xf32>
    %c0_58 = arith.constant 0 : index
    %c0_59 = arith.constant 0 : index
    %285 = vector.load %arg16[%c0_58, %c0_59] : memref<1x64xf32, #tpu.memory_space<vmem>>, vector<1x64xf32>
    %286 = vector.broadcast %285 : vector<1x64xf32> to vector<16x64xf32>
    %287 = arith.addf %284, %286 : vector<16x64xf32>
    %cst_60 = arith.constant 0.000000e+00 : f32
    %288 = vector.broadcast %cst_60 : f32 to vector<16x64xf32>
    %289 = arith.maximumf %287, %288 : vector<16x64xf32>
    %290 = arith.truncf %289 : vector<16x64xf32> to vector<16x64xbf16>
    %c0_61 = arith.constant 0 : index
    %c0_62 = arith.constant 0 : index
    %291 = vector.load %arg17[%c0_61, %c0_62] : memref<64x32xbf16, #tpu.memory_space<vmem>>, vector<64x32xbf16>
    %cst_63 = arith.constant dense<0.000000e+00> : vector<16x32xf32>
    %292 = tpu.matmul %290, %291, %cst_63 {dimension_numbers = #tpu.dot_dimension_numbers<[1], [0], [0], [1], [0, 0, 1, 1], [], []>} : vector<16x64xbf16>, vector<64x32xbf16>, vector<16x32xf32> -> vector<16x32xf32>
    %c0_64 = arith.constant 0 : index
    %c0_65 = arith.constant 0 : index
    %293 = vector.load %arg18[%c0_64, %c0_65] : memref<1x32xf32, #tpu.memory_space<vmem>>, vector<1x32xf32>
    %294 = vector.broadcast %293 : vector<1x32xf32> to vector<16x32xf32>
    %295 = arith.addf %292, %294 : vector<16x32xf32>
    %296 = arith.addf %281, %295 : vector<16x32xf32>
    %297 = vector.extract_strided_slice %3 {offsets = [2, 0], sizes = [1, 32], strides = [1, 1]} : vector<3x32xf32> to vector<1x32xf32>
    %298 = vector.extract_strided_slice %4 {offsets = [2, 0], sizes = [1, 32], strides = [1, 1]} : vector<3x32xf32> to vector<1x32xf32>
    %cst_66 = arith.constant dense<0.000000e+00> : vector<16xf32>
    %299 = vector.multi_reduction <add>, %296, %cst_66 [1] : vector<16x32xf32> to vector<16xf32>
    %300 = vector.shape_cast %299 : vector<16xf32> to vector<16x1xf32>
    %cst_67 = arith.constant 3.200000e+01 : f32
    %301 = vector.broadcast %cst_67 : f32 to vector<16x1xf32>
    %302 = arith.divf %300, %301 : vector<16x1xf32>
    %303 = vector.broadcast %302 : vector<16x1xf32> to vector<16x32xf32>
    %304 = arith.subf %296, %303 : vector<16x32xf32>
    %305 = arith.mulf %304, %304 : vector<16x32xf32>
    %cst_68 = arith.constant dense<0.000000e+00> : vector<16xf32>
    %306 = vector.multi_reduction <add>, %305, %cst_68 [1] : vector<16x32xf32> to vector<16xf32>
    %307 = vector.shape_cast %306 : vector<16xf32> to vector<16x1xf32>
    %cst_69 = arith.constant 3.200000e+01 : f32
    %308 = vector.broadcast %cst_69 : f32 to vector<16x1xf32>
    %309 = arith.divf %307, %308 : vector<16x1xf32>
    %cst_70 = arith.constant 9.99999974E-6 : f32
    %310 = vector.broadcast %cst_70 : f32 to vector<16x1xf32>
    %311 = arith.addf %309, %310 : vector<16x1xf32>
    %312 = math.rsqrt %311 : vector<16x1xf32>
    %313 = vector.broadcast %312 : vector<16x1xf32> to vector<16x32xf32>
    %314 = arith.mulf %304, %313 : vector<16x32xf32>
    %315 = vector.broadcast %297 : vector<1x32xf32> to vector<16x32xf32>
    %316 = arith.mulf %314, %315 : vector<16x32xf32>
    %317 = vector.broadcast %298 : vector<1x32xf32> to vector<16x32xf32>
    %318 = arith.addf %316, %317 : vector<16x32xf32>
    %c0_71 = arith.constant 0 : index
    %c0_72 = arith.constant 0 : index
    %319 = vector.load %arg21[%c0_71, %c0_72] : memref<16x32xf32, #tpu.memory_space<vmem>>, vector<16x32xf32>
    tpu.vector_store %arg21[%c0_71, %c0_72], %318 {strides = array<i32>} : memref<16x32xf32, #tpu.memory_space<vmem>>, vector<16x32xf32>,
    return
  }
  func.func @transform_0(%arg0: i32) -> (i32, i32) {
    %c0_i32 = arith.constant 0 : i32
    %c0_i32_0 = arith.constant 0 : i32
    return %arg0, %c0_i32 : i32, i32
  }
  func.func @transform_1(%arg0: i32) -> (i32, i32) {
    %c0_i32 = arith.constant 0 : i32
    %c0_i32_0 = arith.constant 0 : i32
    return %arg0, %c0_i32 : i32, i32
  }
  func.func @transform_2(%arg0: i32) -> (i32, i32, i32) {
    %c0_i32 = arith.constant 0 : i32
    %c0_i32_0 = arith.constant 0 : i32
    %c0_i32_1 = arith.constant 0 : i32
    return %arg0, %c0_i32, %c0_i32_0 : i32, i32, i32
  }
  func.func @transform_3(%arg0: i32) -> (i32, i32, i32) {
    %c0_i32 = arith.constant 0 : i32
    %c0_i32_0 = arith.constant 0 : i32
    %c0_i32_1 = arith.constant 0 : i32
    return %arg0, %c0_i32, %c0_i32_0 : i32, i32, i32
  }
  func.func @transform_4(%arg0: i32) -> (i32, i32) {
    %c0_i32 = arith.constant 0 : i32
    %c0_i32_0 = arith.constant 0 : i32
    %c0_i32_1 = arith.constant 0 : i32
    return %c0_i32, %c0_i32_0 : i32, i32
  }
  func.func @transform_5(%arg0: i32) -> (i32, i32) {
    %c0_i32 = arith.constant 0 : i32
    %c0_i32_0 = arith.constant 0 : i32
    %c0_i32_1 = arith.constant 0 : i32
    return %c0_i32, %c0_i32_0 : i32, i32
  }
  func.func @transform_6(%arg0: i32) -> (i32, i32) {
    %c0_i32 = arith.constant 0 : i32
    %c0_i32_0 = arith.constant 0 : i32
    %c0_i32_1 = arith.constant 0 : i32
    return %c0_i32, %c0_i32_0 : i32, i32
  }
  func.func @transform_7(%arg0: i32) -> (i32, i32) {
    %c0_i32 = arith.constant 0 : i32
    %c0_i32_0 = arith.constant 0 : i32
    %c0_i32_1 = arith.constant 0 : i32
    return %c0_i32, %c0_i32_0 : i32, i32
  }
  func.func @transform_8(%arg0: i32) -> (i32, i32) {
    %c0_i32 = arith.constant 0 : i32
    %c0_i32_0 = arith.constant 0 : i32
    %c0_i32_1 = arith.constant 0 : i32
    return %c0_i32, %c0_i32_0 : i32, i32
  }
  func.func @transform_9(%arg0: i32) -> (i32, i32) {
    %c0_i32 = arith.constant 0 : i32
    %c0_i32_0 = arith.constant 0 : i32
    %c0_i32_1 = arith.constant 0 : i32
    return %c0_i32, %c0_i32_0 : i32, i32
  }
  func.func @transform_10(%arg0: i32) -> (i32, i32) {
    %c0_i32 = arith.constant 0 : i32
    %c0_i32_0 = arith.constant 0 : i32
    %c0_i32_1 = arith.constant 0 : i32
    return %c0_i32, %c0_i32_0 : i32, i32
  }
  func.func @transform_11(%arg0: i32) -> (i32, i32) {
    %c0_i32 = arith.constant 0 : i32
    %c0_i32_0 = arith.constant 0 : i32
    %c0_i32_1 = arith.constant 0 : i32
    return %c0_i32, %c0_i32_0 : i32, i32
  }
  func.func @transform_12(%arg0: i32) -> (i32, i32) {
    %c0_i32 = arith.constant 0 : i32
    %c0_i32_0 = arith.constant 0 : i32
    %c0_i32_1 = arith.constant 0 : i32
    return %c0_i32, %c0_i32_0 : i32, i32
  }
  func.func @transform_13(%arg0: i32) -> (i32, i32) {
    %c0_i32 = arith.constant 0 : i32
    %c0_i32_0 = arith.constant 0 : i32
    %c0_i32_1 = arith.constant 0 : i32
    return %c0_i32, %c0_i32_0 : i32, i32
  }
  func.func @transform_14(%arg0: i32) -> (i32, i32) {
    %c0_i32 = arith.constant 0 : i32
    %c0_i32_0 = arith.constant 0 : i32
    %c0_i32_1 = arith.constant 0 : i32
    return %c0_i32, %c0_i32_0 : i32, i32
  }
  func.func @transform_15(%arg0: i32) -> (i32, i32) {
    %c0_i32 = arith.constant 0 : i32
    %c0_i32_0 = arith.constant 0 : i32
    %c0_i32_1 = arith.constant 0 : i32
    return %c0_i32, %c0_i32_0 : i32, i32
  }
  func.func @transform_16(%arg0: i32) -> (i32, i32) {
    %c0_i32 = arith.constant 0 : i32
    %c0_i32_0 = arith.constant 0 : i32
    %c0_i32_1 = arith.constant 0 : i32
    return %c0_i32, %c0_i32_0 : i32, i32
  }
  func.func @transform_17(%arg0: i32) -> (i32, i32) {
    %c0_i32 = arith.constant 0 : i32
    %c0_i32_0 = arith.constant 0 : i32
    %c0_i32_1 = arith.constant 0 : i32
    return %c0_i32, %c0_i32_0 : i32, i32
  }
  func.func @transform_18(%arg0: i32) -> (i32, i32) {
    %c0_i32 = arith.constant 0 : i32
    %c0_i32_0 = arith.constant 0 : i32
    %c0_i32_1 = arith.constant 0 : i32
    return %c0_i32, %c0_i32_0 : i32, i32
  }
  func.func @transform_19(%arg0: i32) -> (i32, i32) {
    %c0_i32 = arith.constant 0 : i32
    %c0_i32_0 = arith.constant 0 : i32
    %c0_i32_1 = arith.constant 0 : i32
    return %c0_i32, %c0_i32_0 : i32, i32
  }
  func.func @transform_20(%arg0: i32) -> (i32, i32) {
    %c0_i32 = arith.constant 0 : i32
    %c0_i32_0 = arith.constant 0 : i32
    return %arg0, %c0_i32 : i32, i32
  }
}

</mosaic_0001>

<bundles_post_ra>
// kernel: transformer_decoder_layer.1
= control target key start
LH: loop header
LB: loop body
LE: loop exit
PB: predicated region body
PF: predicated region fallthrough
CT: control target
= control target key end

     0   :  { %vm102_vm0 = vcmask 261120   ;;  %s1829_s21 = smov 120   ;;  %s1831_s22 = smov 96   ;;  %vm158_vm1 = vcmask 64512   ;;  %vm447_vm2 = vcmask 1043456   ;;  %vm624_vm3 = vcmask 130048   ;;  %s2400_s4 = inlined_call_operand.vmem [shape: bf16[32,96], index: 4, kind: input, shape index: {}]   ;;  %s2401_s0 = inlined_call_operand.vmem [shape: f32[16,32], index: 0, kind: input, shape index: {}, may-alias: {0,20}]   ;;  %s2402_s5 = inlined_call_operand.vmem [shape: f32[1,96], index: 5, kind: input, shape index: {}]   ;;  %s2403_s2 = inlined_call_operand.vmem [shape: bf16[2,8,8], index: 2, kind: input, shape index: {}]   ;;  %s2404_s7 = inlined_call_operand.vmem [shape: f32[1,32], index: 7, kind: input, shape index: {}]   ;;  %s2405_s6 = inlined_call_operand.vmem [shape: bf16[32,32], index: 6, kind: input, shape index: {}]   ;;  %s2406_s10 = inlined_call_operand.vmem [shape: bf16[32,64], index: 10, kind: input, shape index: {}]   ;;  %s2407_s1 = inlined_call_operand.vmem [shape: f32[16,32], index: 1, kind: input, shape index: {}]   ;;  %s2408_s11 = inlined_call_operand.vmem [shape: f32[1,64], index: 11, kind: input, shape index: {}]   ;;  %s2409_s9 = inlined_call_operand.vmem [shape: f32[1,32], index: 9, kind: input, shape index: {}]   ;;  %s2410_s8 = inlined_call_operand.vmem [shape: bf16[32,32], index: 8, kind: input, shape index: {}]   ;;  %s2411_s18 = inlined_call_operand.vmem [shape: f32[3,32], index: 18, kind: input, shape index: {}]   ;;  %s2412_s19 = inlined_call_operand.vmem [shape: f32[3,32], index: 19, kind: input, shape index: {}]   ;;  %s2413_s3 = inlined_call_operand.vmem [shape: bf16[2,1,8], index: 3, kind: input, shape index: {}]   ;;  %s2414_s13 = inlined_call_operand.vmem [shape: f32[1,32], index: 13, kind: input, shape index: {}]   ;;  %s2415_s12 = inlined_call_operand.vmem [shape: bf16[32,32], index: 12, kind: input, shape index: {}]   ;;  %s2416_s15 = inlined_call_operand.vmem [shape: f32[1,64], index: 15, kind: input, shape index: {}]   ;;  %s2417_s14 = inlined_call_operand.vmem [shape: bf16[32,64], index: 14, kind: input, shape index: {}]   ;;  %s2418_s17 = inlined_call_operand.vmem [shape: f32[1,32], index: 17, kind: input, shape index: {}]   ;;  %s2419_s16 = inlined_call_operand.vmem [shape: bf16[64,32], index: 16, kind: input, shape index: {}]   ;;  %s2420_s20 = inlined_call_operand.vmem [shape: f32[16,32], index: 20, kind: output, shape index: {}, may-alias: {0,20}]  }
   0x1   :  { %2423 = sst [smem:[#allocation2_spill]] %s2400_s4  ;;  %s1828_s4 = smov 104   ;;  %vm626_vm4 = vcmask 195584  }
   0x2   :  { %2424 = sst [smem:[#allocation3_spill]] %s2401_s0  ;;  %s1830_s0 = smov 112  }
   0x3   :  { %2425 = sst [smem:[#allocation4_spill]] %s2402_s5  ;;  %s1832_s25 = smov 64  }
   0x4   :  { %2426 = sst [smem:[#allocation5_spill]] %s2403_s2  ;;  %s1833_s2 = smov 8  }
   0x5   :  { %2427 = sst [smem:[#allocation6_spill]] %s2404_s7  ;;  %s1835_s27 = smov 24  }
   0x6   :  { %s2428_s23 = sld [smem:[#allocation2_spill]] }
   0x7   :  { %s2429_s26 = sld [smem:[#allocation3_spill]] }
   0x8   :  { %s2430_s30 = sld [smem:[#allocation4_spill]] }
   0x9   :  { %s2431_s5 = sld [smem:[#allocation5_spill]] }
   0xa   :  { %s2432_s24 = sld [smem:[#allocation6_spill]] }
   0xc   :  { %v1685_v0 = vld [vmem:[%s2428_s23 + $0x8] sm:$0xff]  ;;  %v1684_v1 = vld [vmem:[%s2428_s23] sm:$0xff] }
   0xd   :  { %112 = vmatpush.bf16.msra.mxu0 %v1685_v0  ;;  %v1951_v2 = vld [vmem:[%s2429_s26] sm:$0xff]  ;;  %v1956_v3 = vld [vmem:[%s2429_s26 + $0x8] sm:$0xff]  ;;  %s1834_s26 = smov 16  }
   0xe   :  { %v81_v4 = vpack.c.bf16 %v1956_v3, %v1951_v2  ;;  %v1743_v5 = vld [vmem:[%s2430_s30] ss:$0 sm:$0xff] }
   0xf   :  { %v1701_v60 = vld [vmem:[%s2431_s5] sm:$0xff]  }
  0x10   :  { %v1702_v61 = vunpack.c.l.bf16 %v1701_v60 }
  0x11   :  { %113 = vmatpush.bf16.msra.mxu0 %v1684_v1 }
  0x14   :  { %1589 = vmatmul.msk.bf16.vlgmr.msra.gmra.mxu0 %vm102_vm0, %v81_v4 }
  0x91   :  { %v115_v6 = vpop.f32.mrf.mxu0 }
  0x92   :  { %v116_v7 = vadd.f32 %v1743_v5, %v115_v6 }
  0x94   :  { %132 = vrot.lane.b32.xlu1 %v116_v7, %s1828_s4  ;;  %126 = vrot.lane.b32.xlu0 %v116_v7, %s1829_s21  ;;  %v145_v30 = vpack.c.bf16 %v116_v7, %v116_v7 }
  0x96   :  { %v154_v33 = vunpack.c.l.b16 %v145_v30 }
  0x98   :  { %v1990_v35 = vpack.c.b16 %v154_v33, %v154_v33 }
  0x99   :  { %v117_v8 = vpop.f32.mrf.mxu0 }
  0x9a   :  { %v118_v9 = vadd.f32 %v1743_v5, %v117_v8  ;;  %v1703_v8 = vunpack.c.h.bf16 %v1701_v60 }
  0x9c   :  { %139 = vrot.lane.b32.xlu2 %v118_v9, %s1830_s0  ;;  %136 = vrot.lane.b32.xlu1 %v118_v9, %s1829_s21  ;;  %v149_v37 = vpack.c.bf16 %v118_v9, %v118_v9 }
  0x9d   :  { %129 = vrot.lane.b32.xlu0 %v116_v7, %s1830_s0 }
  0x9e   :  { %v251_v38 = vunpack.c.l.b16 %v149_v37 }
  0xa0   :  { %v1998_v39 = vpack.c.b16 %v251_v38, %v251_v38 }
  0xa4   :  { %142 = vrot.lane.b32.xlu2 %v118_v9, %s1828_s4 }
  0xf6   :  { %v140_v10 = vpop.permute.xlu2 %139 }
  0xf7   :  { %v151_v31 = vpack.c.bf16 %v140_v10, %v140_v10 }
  0xf9   :  { %v299_v34 = vunpack.c.l.b16 %v151_v31 }
  0xfb   :  { %v1992_v36 = vpack.c.b16 %v299_v34, %v299_v34 }
  0xfe   :  { %v143_v15 = vpop.permute.xlu2 %142 }
  0xff   :  { %v152_v18 = vpack.c.bf16 %v143_v15, %v143_v15 }
 0x101   :  { %v323_v22 = vunpack.c.l.b16 %v152_v18 }
 0x103   :  { %v1978_v28 = vpack.c.b16 %v323_v22, %v323_v22 }
 0x106   :  { %v133_v11 = vpop.permute.xlu1 %132  ;;  %v127_v12 = vpop.permute.xlu0 %126 }
 0x107   :  { %v148_v13 = vpack.c.bf16 %v133_v11, %v133_v11  ;;  %v146_v14 = vpack.c.bf16 %v127_v12, %v127_v12 }
 0x109   :  { %v227_v16 = vunpack.c.l.b16 %v148_v13  ;;  %v179_v17 = vunpack.c.l.b16 %v146_v14 }
 0x10b   :  { %v1970_v19 = vpack.c.b16 %v227_v16, %v227_v16  ;;  %v1972_v20 = vpack.c.b16 %v179_v17, %v179_v17 }
 0x10d   :  { %229 = vrot.lane.b32.xlu2 %v1970_v19, %s1831_s22  ;;  %181 = vrot.lane.b32.xlu0 %v1972_v20, %s1831_s22 }
 0x10e   :  { %v137_v21 = vpop.permute.xlu1 %136 }
 0x10f   :  { %v150_v23 = vpack.c.bf16 %v137_v21, %v137_v21  ;;  %v130_v24 = vpop.permute.xlu0 %129 }
 0x110   :  { %v147_v25 = vpack.c.bf16 %v130_v24, %v130_v24 }
 0x111   :  { %v275_v26 = vunpack.c.l.b16 %v150_v23 }
 0x112   :  { %v203_v27 = vunpack.c.l.b16 %v147_v25 }
 0x113   :  { %v1980_v29 = vpack.c.b16 %v275_v26, %v275_v26 }
 0x114   :  { %v1982_v32 = vpack.c.b16 %v203_v27, %v203_v27 }
 0x115   :  { %325 = vrot.lane.b32.xlu2 %v1978_v28, %s1831_s22  ;;  %277 = vrot.lane.b32.xlu0 %v1980_v29, %s1831_s22 }
 0x116   :  { %205 = vrot.lane.b32.xlu1 %v1982_v32, %s1831_s22 }
 0x11d   :  { %156 = vrot.lane.b32.xlu0 %v1990_v35, %s1831_s22 }
 0x11e   :  { %301 = vrot.lane.b32.xlu1 %v1992_v36, %s1831_s22 }
 0x126   :  { %253 = vrot.lane.b32.xlu1 %v1998_v39, %s1831_s22 }
 0x167   :  { %v230_v40 = vpop.permute.xlu2 %229 }
 0x168   :  { %v235_v41 = vsel %vm158_vm1, %v230_v40, 0 }
 0x169   :  { %244 = vmatpush.bf16.xpose.msrb.mxu0 %v235_v41 }
 0x16f   :  { %v326_v42 = vpop.permute.xlu2 %325 }
 0x170   :  { %v331_v43 = vsel %vm158_vm1, %v326_v42, 0  ;;  %1593 = vmatmul.msk.bf16.vlgmr.msrb.gmra.mxu0 %vm158_vm1, %v148_v13 }
 0x171   :  { %340 = vmatpush.bf16.xpose.msra.mxu0 %v331_v43 }
 0x17f   :  { %v182_v44 = vpop.permute.xlu0 %181 }
 0x180   :  { %1597 = vmatmul.msk.bf16.vlgmr.msra.gmra.mxu0 %vm158_vm1, %v152_v18  ;;  %v187_v45 = vsel %vm158_vm1, %v182_v44, 0 }
 0x181   :  { %196 = vmatpush.bf16.xpose.msra.mxu2 %v187_v45 }
 0x187   :  { %v278_v46 = vpop.permute.xlu0 %277 }
 0x188   :  { %v206_v47 = vpop.permute.xlu1 %205  ;;  %1591 = vmatmul.msk.bf16.vlgmr.msra.gmra.mxu2 %vm158_vm1, %v146_v14  ;;  %v283_v48 = vsel %vm158_vm1, %v278_v46, 0 }
 0x189   :  { %v211_v49 = vsel %vm158_vm1, %v206_v47, 0  ;;  %292 = vmatpush.bf16.xpose.msrb.mxu2 %v283_v48 }
 0x18a   :  { %220 = vmatpush.bf16.xpose.msra.mxu3 %v211_v49 }
 0x18f   :  { %v157_v50 = vpop.permute.xlu0 %156 }
 0x190   :  { %v302_v51 = vpop.permute.xlu1 %301  ;;  %v163_v52 = vsel %vm158_vm1, %v157_v50, 0 }
 0x191   :  { %1592 = vmatmul.msk.bf16.vlgmr.msra.gmra.mxu3 %vm158_vm1, %v147_v25  ;;  %172 = vmatpush.bf16.xpose.msra.mxu1 %v163_v52  ;;  %v307_v53 = vsel %vm158_vm1, %v302_v51, 0 }
 0x192   :  { %316 = vmatpush.bf16.xpose.msrb.mxu3 %v307_v53 }
 0x198   :  { %v254_v54 = vpop.permute.xlu1 %253  ;;  %1590 = vmatmul.msk.bf16.vlgmr.msra.gmra.mxu1 %vm158_vm1, %v145_v30  ;;  %1595 = vmatmul.msk.bf16.vlgmr.msrb.gmra.mxu2 %vm158_vm1, %v150_v23 }
 0x199   :  { %v259_v55 = vsel %vm158_vm1, %v254_v54, 0 }
 0x19a   :  { %268 = vmatpush.bf16.xpose.msrb.mxu1 %v259_v55 }
 0x1a1   :  { %1596 = vmatmul.msk.bf16.vlgmr.msrb.gmra.mxu3 %vm158_vm1, %v151_v31 }
 0x1a8   :  { %1594 = vmatmul.msk.bf16.vlgmr.msrb.gmra.mxu1 %vm158_vm1, %v149_v37 }
 0x1ed   :  { %v246_v56 = vpop.f32.mrf.mxu0 }
 0x1ee   :  { %v247_v13 = vadd.f32 %v1702_v61, %v246_v56 }
 0x1f0   :  { %v355_v21 = vsel %vm158_vm1, %v247_v13, -inf }
 0x1f5   :  { %v248_v57 = vpop.f32.mrf.mxu0 }
 0x1fd   :  { %v342_v58 = vpop.f32.mrf.mxu0 }
 0x1fe   :  { %v2027_v11 = vadd.f32 %v1703_v8, %v342_v58 }
 0x200   :  { %v367_v18 = vsel %vm158_vm1, %v2027_v11, -inf }
 0x205   :  { %v344_v59 = vpop.f32.mrf.mxu0 }
 0x20b   :  { %v198_v62 = vpop.f32.mrf.mxu2 }
 0x20c   :  { %v199_v63 = vadd.f32 %v1702_v61, %v198_v62 }
 0x20e   :  { %v349_v0 = vsel %vm158_vm1, %v199_v63, -inf }
 0x20f   :  { %350 = vmax.xlane.f32.xlu2 %v349_v0 }
 0x213   :  { %v200_v1 = vpop.f32.mrf.mxu2 }
 0x214   :  { %v222_v4 = vpop.f32.mrf.mxu3 }
 0x215   :  { %v223_v5 = vadd.f32 %v1702_v61, %v222_v4  ;;  %v174_v6 = vpop.f32.mrf.mxu1 }
 0x216   :  { %v2022_v7 = vadd.f32 %v1702_v61, %v174_v6 }
 0x217   :  { %v352_v9 = vsel %vm158_vm1, %v223_v5, -inf }
 0x218   :  { %353 = vmax.xlane.f32.xlu0 %v352_v9  ;;  %v346_v10 = vsel %vm158_vm1, %v2022_v7, -inf }
 0x219   :  { %347 = vmax.xlane.f32.xlu1 %v346_v10 }
 0x21b   :  { %v294_v12 = vpop.f32.mrf.mxu2 }
 0x21c   :  { %v224_v14 = vpop.f32.mrf.mxu3  ;;  %v295_v15 = vadd.f32 %v1703_v8, %v294_v12 }
 0x21d   :  { %v176_v16 = vpop.f32.mrf.mxu1 }
 0x21e   :  { %v361_v17 = vsel %vm158_vm1, %v295_v15, -inf }
 0x21f   :  { %362 = vmax.xlane.f32.xlu2 %v361_v17 }
 0x220   :  { %368 = vmax.xlane.f32.xlu0 %v367_v18 }
 0x221   :  { %356 = vmax.xlane.f32.xlu1 %v355_v21 }
 0x223   :  { %v296_v22 = vpop.f32.mrf.mxu2 }
 0x224   :  { %v318_v23 = vpop.f32.mrf.mxu3 }
 0x225   :  { %v319_v24 = vadd.f32 %v1703_v8, %v318_v23  ;;  %v270_v25 = vpop.f32.mrf.mxu1 }
 0x226   :  { %v2033_v26 = vadd.f32 %v1703_v8, %v270_v25 }
 0x227   :  { %v364_v27 = vsel %vm158_vm1, %v319_v24, -inf }
 0x228   :  { %365 = vmax.xlane.f32.xlu2 %v364_v27  ;;  %v358_v30 = vsel %vm158_vm1, %v2033_v26, -inf }
 0x229   :  { %359 = vmax.xlane.f32.xlu0 %v358_v30 }
 0x22c   :  { %v320_v31 = vpop.f32.mrf.mxu3 }
 0x22d   :  { %v272_v33 = vpop.f32.mrf.mxu1 }
 0x23d   :  { %506 = vrot.lane.b32.xlu0 %v1970_v19, %s1832_s25 }
 0x245   :  { %548 = vrot.lane.b32.xlu0 %v1980_v29, %s1832_s25 }
 0x24d   :  { %569 = vrot.lane.b32.xlu0 %v1992_v36, %s1832_s25 }
 0x282   :  { %v351_v34 = vpop.xlane.xlu2 %350 }
 0x283   :  { %v371_v37 = vsub.f32 %v199_v63, %v351_v34 }
 0x285   :  { %v380_v38 = vmul.f32 1.442695, %v371_v37 }
 0x287   :  { %1750 = vpow2.f32 %v380_v38 }
 0x28b   :  { %v354_v40 = vpop.xlane.xlu0 %353 }
 0x28c   :  { %v372_v41 = vsub.f32 %v223_v5, %v354_v40  ;;  %v348_v42 = vpop.xlane.xlu1 %347 }
 0x28d   :  { %v2044_v43 = vpop.eup %1750  ;;  %v370_v63 = vsub.f32 %v2022_v7, %v348_v42 }
 0x28e   :  { %v382_v44 = vmul.f32 1.442695, %v372_v41  ;;  %v397_v45 = vsel %vm158_vm1, %v2044_v43, 0.0 }
 0x28f   :  { %398 = vadd.xlane.f32.xlu2 %v397_v45  ;;  %v378_v0 = vmul.f32 1.442695, %v370_v63 }
 0x290   :  { %1752 = vpow2.f32 %v382_v44 }
 0x292   :  { %v363_v19 = vpop.xlane.xlu2 %362 }
 0x293   :  { %v375_v29 = vsub.f32 %v295_v15, %v363_v19  ;;  %v369_v54 = vpop.xlane.xlu0 %368 }
 0x294   :  { %v357_v46 = vpop.xlane.xlu1 %356  ;;  %v377_v1 = vsub.f32 %v2027_v11, %v369_v54 }
 0x295   :  { %v388_v47 = vmul.f32 1.442695, %v375_v29  ;;  %v373_v36 = vsub.f32 %v247_v13, %v357_v46 }
 0x296   :  { %v2048_v48 = vpop.eup %1752 }
 0x297   :  { %1754 = vpow2.f32 %v388_v47  ;;  %v384_v49 = vmul.f32 1.442695, %v373_v36  ;;  %v400_v50 = vsel %vm158_vm1, %v2048_v48, 0.0 }
 0x298   :  { %401 = vadd.xlane.f32.xlu0 %v400_v50 }
 0x299   :  { %1756 = vpow2.f32 %v384_v49 }
 0x29b   :  { %v366_v59 = vpop.xlane.xlu2 %365 }
 0x29c   :  { %v360_v56 = vpop.xlane.xlu0 %359  ;;  %v376_v60 = vsub.f32 %v319_v24, %v366_v59 }
 0x29d   :  { %v1755_v51 = vpop.eup %1754 }
 0x29e   :  { %v409_v52 = vsel %vm158_vm1, %v1755_v51, 0.0  ;;  %v390_v61 = vmul.f32 1.442695, %v376_v60 }
 0x29f   :  { %v1757_v53 = vpop.eup %1756 }
 0x2a0   :  { %410 = vadd.xlane.f32.xlu0 %v409_v52  ;;  %v403_v55 = vsel %vm158_vm1, %v1757_v53, 0.0  ;;  %1758 = vpow2.f32 %v390_v61 }
 0x2a1   :  { %404 = vadd.xlane.f32.xlu1 %v403_v55  ;;  %1760 = vpow2.f32 %v378_v0 }
 0x2a6   :  { %v2061_v62 = vpop.eup %1758 }
 0x2a7   :  { %464 = vrot.lane.b32.xlu2 %v1972_v20, %s1832_s25  ;;  %v412_v20 = vsel %vm158_vm1, %v2061_v62, 0.0  ;;  %v2067_v4 = vpop.eup %1760 }
 0x2a8   :  { %v394_v5 = vsel %vm158_vm1, %v2067_v4, 0.0 }
 0x2af   :  { %v507_v57 = vpop.permute.xlu0 %506 }
 0x2b0   :  { %v512_v58 = vsel %vm447_vm2, %v507_v57, 0 }
 0x2b1   :  { %521 = vmatpush.bf16.msrb.mxu0 %v512_v58 }
 0x2b4   :  { %590 = vrot.lane.b32.xlu0 %v1978_v28, %s1832_s25  ;;  %v392_v28 = vmul.f32 1.442695, %v377_v1 }
 0x2b6   :  { %1762 = vpow2.f32 %v392_v28 }
 0x2b7   :  { %v549_v11 = vpop.permute.xlu0 %548 }
 0x2ba   :  { %485 = vrot.lane.b32.xlu1 %v1982_v32, %s1832_s25  ;;  %v374_v32 = vsub.f32 %v2033_v26, %v360_v56 }
 0x2bc   :  { %v386_v6 = vmul.f32 1.442695, %v374_v32  ;;  %v2072_v7 = vpop.eup %1762 }
 0x2bd   :  { %v415_v8 = vsel %vm158_vm1, %v2072_v7, 0.0 }
 0x2be   :  { %1764 = vpow2.f32 %v386_v6 }
 0x2bf   :  { %v570_v13 = vpop.permute.xlu0 %569 }
 0x2c0   :  { %v575_v41 = vsel %vm447_vm2, %v570_v13, 0 }
 0x2c4   :  { %v2076_v9 = vpop.eup %1764 }
 0x2c5   :  { %v406_v10 = vsel %vm158_vm1, %v2076_v9, 0.0 }
 0x2d0   :  { %413 = vadd.xlane.f32.xlu2 %v412_v20 }
 0x2de   :  { %395 = vadd.xlane.f32.xlu0 %v394_v5 }
 0x2e4   :  { %416 = vadd.xlane.f32.xlu1 %v415_v8 }
 0x2e8   :  { %442 = vrot.lane.b32.xlu2 %v1990_v35, %s1832_s25  ;;  %v554_v35 = vsel %vm447_vm2, %v549_v11, 0 }
 0x2ec   :  { %407 = vadd.xlane.f32.xlu1 %v406_v10 }
 0x302   :  { %v399_v12 = vpop.xlane.xlu2 %398 }
 0x303   :  { %1766 = vrcp.f32 %v399_v12 }
 0x305   :  { %527 = vrot.lane.b32.xlu1 %v1998_v39, %s1832_s25 }
 0x309   :  { %v1767_v14 = vpop.eup %1766 }
 0x30a   :  { %v427_v15 = vmul.f32 %v1767_v14, %v2044_v43  ;;  %v465_v16 = vpop.permute.xlu2 %464  ;;  %v1687_v14 = vld [vmem:[%s2405_s6 + $0x8] sm:$0xff] }
 0x30b   :  { %v470_v17 = vsel %vm447_vm2, %v465_v16, 0  ;;  %v402_v18 = vpop.xlane.xlu0 %401 }
 0x30c   :  { %v435_v21 = vpack.c.bf16 %v427_v15, %v427_v15  ;;  %479 = vmatpush.bf16.msra.mxu2 %v470_v17  ;;  %v1686_v15 = vld [vmem:[%s2405_s6] sm:$0xff] }
 0x30f   :  { %1599 = vmatmul.msk.bf16.vlgmr.msra.gmra.mxu2 %vm158_vm1, %v435_v21 }
 0x310   :  { %563 = vmatpush.bf16.msrb.mxu2 %v554_v35 }
 0x313   :  { %v411_v22 = vpop.xlane.xlu0 %410 }
 0x314   :  { %1768 = vrcp.f32 %v411_v22  ;;  %v405_v23 = vpop.xlane.xlu1 %404 }
 0x315   :  { %1770 = vrcp.f32 %v405_v23 }
 0x316   :  { %1772 = vrcp.f32 %v402_v18 }
 0x31a   :  { %v1769_v24 = vpop.eup %1768 }
 0x31b   :  { %v1771_v39 = vpop.eup %1770  ;;  %v431_v25 = vmul.f32 %v1769_v24, %v1755_v51 }
 0x31c   :  { %v429_v26 = vmul.f32 %v1771_v39, %v1757_v53  ;;  %v1773_v34 = vpop.eup %1772 }
 0x31d   :  { %v439_v27 = vpack.c.bf16 %v431_v25, %v431_v25  ;;  %v428_v37 = vmul.f32 %v1773_v34, %v2048_v48 }
 0x31e   :  { %v437_v30 = vpack.c.bf16 %v429_v26, %v429_v26 }
 0x31f   :  { %1603 = vmatmul.msk.bf16.vlgmr.msrb.gmra.mxu2 %vm158_vm1, %v439_v27  ;;  %v436_v42 = vpack.c.bf16 %v428_v37, %v428_v37  ;;  %v1744_v37 = vld [vmem:[%s2432_s24] ss:$0 sm:$0xff] }
 0x320   :  { %1601 = vmatmul.msk.bf16.vlgmr.msrb.gmra.mxu0 %vm158_vm1, %v437_v30 }
 0x326   :  { %v591_v31 = vpop.permute.xlu0 %590 }
 0x327   :  { %v596_v33 = vsel %vm447_vm2, %v591_v31, 0 }
 0x328   :  { %605 = vmatpush.bf16.msra.mxu0 %v596_v33 }
 0x32c   :  { %v486_v38 = vpop.permute.xlu1 %485 }
 0x32d   :  { %v491_v40 = vsel %vm447_vm2, %v486_v38, 0 }
 0x32e   :  { %500 = vmatpush.bf16.msra.mxu3 %v491_v40 }
 0x331   :  { %1600 = vmatmul.msk.bf16.vlgmr.msra.gmra.mxu3 %vm158_vm1, %v436_v42 }
 0x332   :  { %584 = vmatpush.bf16.msrb.mxu3 %v575_v41 }
 0x343   :  { %v414_v43 = vpop.xlane.xlu2 %413 }
 0x344   :  { %1774 = vrcp.f32 %v414_v43 }
 0x34a   :  { %v1775_v44 = vpop.eup %1774 }
 0x34b   :  { %v432_v45 = vmul.f32 %v1775_v44, %v2061_v62  ;;  %v443_v19 = vpop.permute.xlu2 %442 }
 0x34c   :  { %v449_v29 = vsel %vm447_vm2, %v443_v19, 0 }
 0x34d   :  { %v440_v46 = vpack.c.bf16 %v432_v45, %v432_v45  ;;  %458 = vmatpush.bf16.msra.mxu1 %v449_v29  ;;  %v1836_v29 = vmov 32.0  }
 0x34f   :  { %1604 = vmatmul.msk.bf16.vlgmr.msrb.gmra.mxu3 %vm158_vm1, %v440_v46 }
 0x351   :  { %v396_v47 = vpop.xlane.xlu0 %395 }
 0x352   :  { %1776 = vrcp.f32 %v396_v47 }
 0x357   :  { %v417_v36 = vpop.xlane.xlu1 %416 }
 0x358   :  { %v1777_v48 = vpop.eup %1776  ;;  %1778 = vrcp.f32 %v417_v36  ;;  %v1691_v36 = vld [vmem:[%s2406_s10 + $0x8] sm:$0xff] }
 0x359   :  { %v426_v49 = vmul.f32 %v1777_v48, %v2067_v4  ;;  %802 = vmatpush.bf16.msra.mxu3 %v1691_v36 }
 0x35b   :  { %v434_v50 = vpack.c.bf16 %v426_v49, %v426_v49  ;;  %v69_v49 = vld [vmem:[%s2407_s1 + $0x8] sm:$0xff] }
 0x35d   :  { %1598 = vmatmul.msk.bf16.vlgmr.msra.gmra.mxu1 %vm158_vm1, %v434_v50 }
 0x35e   :  { %v1779_v51 = vpop.eup %1778 }
 0x35f   :  { %v433_v52 = vmul.f32 %v1779_v51, %v2072_v7  ;;  %v408_v54 = vpop.xlane.xlu1 %407 }
 0x360   :  { %1780 = vrcp.f32 %v408_v54 }
 0x361   :  { %v441_v53 = vpack.c.bf16 %v433_v52, %v433_v52  ;;  %1782 = vrcp.f32 %v1836_v29 }
 0x363   :  { %1605 = vmatmul.msk.bf16.vlgmr.msra.gmra.mxu0 %vm158_vm1, %v441_v53 }
 0x366   :  { %v1781_v55 = vpop.eup %1780 }
 0x367   :  { %v430_v56 = vmul.f32 %v1781_v55, %v2076_v9  ;;  %v1783_v46 = vpop.eup %1782 }
 0x368   :  { %v685_v47 = vmul.f32 32.0, %v1783_v46  ;;  %vm689_vm5 = vweird.f32 %v1783_v46 }
 0x369   :  { %v438_v59 = vpack.c.bf16 %v430_v56, %v430_v56 }
 0x36a   :  { %v686_v48 = vsub.f32 1.0, %v685_v47 }
 0x36c   :  { %v687_v51 = vmul.f32 %v1783_v46, %v686_v48  ;;  %v1746_v48 = vld [vmem:[%s2409_s9] ss:$0 sm:$0xff] }
 0x36e   :  { %v688_v52 = vadd.f32 %v1783_v46, %v687_v51 }
 0x370   :  { %v2141_v53 = vsel %vm689_vm5, %v1783_v46, %v688_v52 }
 0x377   :  { %v528_v57 = vpop.permute.xlu1 %527 }
 0x378   :  { %v533_v58 = vsel %vm447_vm2, %v528_v57, 0 }
 0x379   :  { %542 = vmatpush.bf16.msrb.mxu1 %v533_v58 }
 0x37c   :  { %1602 = vmatmul.msk.bf16.vlgmr.msrb.gmra.mxu1 %vm158_vm1, %v438_v59 }
 0x37d   :  { %668 = vmatpush.bf16.msra.mxu1 %v1687_v14 }
 0x381   :  { %669 = vmatpush.bf16.msra.mxu1 %v1686_v15 }
 0x392   :  { %v481_v60 = vpop.f32.mrf.mxu2 }
 0x39a   :  { %v483_v61 = vpop.f32.mrf.mxu2 }
 0x39d   :  { %v523_v62 = vpop.f32.mrf.mxu0 }
 0x3a2   :  { %v565_v63 = vpop.f32.mrf.mxu2 }
 0x3a3   :  { %v1713_v20 = vpack.i.bf16 %v565_v63, %v481_v60 }
 0x3a5   :  { %v525_v0 = vpop.f32.mrf.mxu0  ;;  %1714 = vrot.lane.b32.xlu2 %v1713_v20, %s1833_s2  ;;  %v1689_v20 = vld [vmem:[%s2410_s8 + $0x8] sm:$0xff] }
 0x3a6   :  { %765 = vmatpush.bf16.msra.mxu2 %v1689_v20 }
 0x3aa   :  { %v567_v1 = vpop.f32.mrf.mxu2 }
 0x3b4   :  { %v502_v28 = vpop.f32.mrf.mxu3 }
 0x3bc   :  { %v504_v4 = vpop.f32.mrf.mxu3 }
 0x3bd   :  { %v1688_v4 = vld [vmem:[%s2410_s8] sm:$0xff] }
 0x3be   :  { %766 = vmatpush.bf16.msra.mxu2 %v1688_v4 }
 0x3d2   :  { %v586_v32 = vpop.f32.mrf.mxu3 }
 0x3d3   :  { %v1718_v5 = vpack.i.bf16 %v586_v32, %v502_v28  ;;  %v1745_v32 = vld [vmem:[%s2408_s11] ss:$0 sm:$0xff] }
 0x3d5   :  { %1719 = vrot.lane.b32.xlu2 %v1718_v5, %s1834_s26 }
 0x3da   :  { %v460_v6 = vpop.f32.mrf.mxu1  ;;  %v588_v7 = vpop.f32.mrf.mxu3 }
 0x3e0   :  { %v607_v8 = vpop.f32.mrf.mxu0 }
 0x3e1   :  { %v1723_v9 = vpack.i.bf16 %v607_v8, %v523_v62 }
 0x3e2   :  { %v462_v10 = vpop.f32.mrf.mxu1 }
 0x3e3   :  { %1724 = vrot.lane.b32.xlu1 %v1723_v9, %s1835_s27 }
 0x3e8   :  { %v609_v11 = vpop.f32.mrf.mxu0 }
 0x3f9   :  { %v544_v12 = vpop.f32.mrf.mxu1 }
 0x3ff   :  { %v1715_v16 = vpop.permute.xlu2 %1714 }
 0x400   :  { %v1717_v18 = vunpack.i.h.bf16 %v1715_v16  ;;  %v1716_v35 = vunpack.i.l.bf16 %v1715_v16 }
 0x401   :  { %v546_v13 = vpop.f32.mrf.mxu1 }
 0x402   :  { %v623_v24 = vsel %vm158_vm1, %v460_v6, %v1716_v35  ;;  %v640_v39 = vsel %vm158_vm1, %v544_v12, %v1717_v18 }
 0x42f   :  { %v1720_v17 = vpop.permute.xlu2 %1719 }
 0x430   :  { %v1722_v21 = vunpack.i.h.bf16 %v1720_v17  ;;  %v1721_v22 = vunpack.i.l.bf16 %v1720_v17 }
 0x432   :  { %v625_v27 = vsel %vm624_vm3, %v623_v24, %v1721_v22  ;;  %v641_v30 = vsel %vm624_vm3, %v640_v39, %v1722_v21 }
 0x455   :  { %v1725_v23 = vpop.permute.xlu1 %1724 }
 0x456   :  { %v1727_v25 = vunpack.i.h.bf16 %v1725_v23  ;;  %v1726_v26 = vunpack.i.l.bf16 %v1725_v23 }
 0x458   :  { %v627_v31 = vsel %vm626_vm4, %v625_v27, %v1726_v26  ;;  %v642_v33 = vsel %vm626_vm4, %v641_v30, %v1727_v25  ;;  %v2172_v25 = vld [vmem:[%s2411_s18] sm:$0x7] }
 0x459   :  { %v643_v34 = vpack.c.bf16 %v642_v33, %v627_v31  ;;  %v729_v31 = vperm.slane %v2172_v25, 0 }
 0x45b   :  { %1614 = vmatmul.msk.bf16.vlgmr.msra.gmra.mxu1 %vm102_vm0, %v643_v34  ;;  %v2179_v34 = vld [vmem:[%s2412_s19] sm:$0x7] }
 0x4d8   :  { %v671_v38 = vpop.f32.mrf.mxu1 }
 0x4d9   :  { %v672_v40 = vadd.f32 %v1744_v37, %v671_v38 }
 0x4db   :  { %v676_v41 = vadd.f32 %v672_v40, %v1951_v2  ;;  %v1690_v2 = vld [vmem:[%s2406_s10] sm:$0xff]  ;;  %v732_v40 = vperm.slane %v2179_v34, 0 }
 0x4dc   :  { %803 = vmatpush.bf16.msra.mxu3 %v1690_v2 }
 0x4dd   :  { %v678_v42 = vsel %vm102_vm0, %v676_v41, 0.0 }
 0x4de   :  { %679 = vadd.xlane.f32.xlu0 %v678_v42 }
 0x4e0   :  { %v673_v43 = vpop.f32.mrf.mxu1 }
 0x4e1   :  { %v674_v44 = vadd.f32 %v1744_v37, %v673_v43 }
 0x4e3   :  { %v677_v45 = vadd.f32 %v674_v44, %v1956_v3  ;;  %v68_v3 = vld [vmem:[%s2407_s1] sm:$0xff] }
 0x4e4   :  { %v70_v50 = vpack.c.bf16 %v69_v49, %v68_v3 }
 0x4e5   :  { %v681_v19 = vsel %vm102_vm0, %v677_v45, 0.0 }
 0x4e6   :  { %682 = vadd.xlane.f32.xlu2 %v681_v19  ;;  %1632 = vmatmul.msk.bf16.vlgmr.msra.gmra.mxu3 %vm102_vm0, %v70_v50 }
 0x551   :  { %v680_v54 = vpop.xlane.xlu0 %679 }
 0x552   :  { %v691_v55 = vmul.f32 %v2141_v53, %v680_v54 }
 0x554   :  { %v693_v56 = vsub.f32 %v676_v41, %v691_v55 }
 0x556   :  { %v695_v57 = vmul.f32 %v693_v56, %v693_v56 }
 0x558   :  { %v697_v58 = vsel %vm102_vm0, %v695_v57, 0.0 }
 0x559   :  { %v683_v59 = vpop.xlane.xlu2 %682  ;;  %698 = vadd.xlane.f32.xlu1 %v697_v58 }
 0x55a   :  { %v692_v60 = vmul.f32 %v2141_v53, %v683_v59 }
 0x55c   :  { %v694_v61 = vsub.f32 %v677_v45, %v692_v60 }
 0x55e   :  { %v696_v62 = vmul.f32 %v694_v61, %v694_v61 }
 0x560   :  { %v700_v63 = vsel %vm102_vm0, %v696_v62, 0.0 }
 0x561   :  { %701 = vadd.xlane.f32.xlu0 %v700_v63 }
 0x569   :  { %v805_v5 = vpop.f32.mrf.mxu3 }
 0x56a   :  { %v806_v8 = vadd.f32 %v1745_v32, %v805_v5 }
 0x56c   :  { %v2160_v11 = vpack.c.bf16 %v806_v8, %v806_v8 }
 0x56e   :  { %v877_v13 = vsel %vm158_vm1, %v2160_v11, 0 }
 0x56f   :  { %886 = vmatpush.bf16.xpose.msrb.mxu0 %v877_v13 }
 0x571   :  { %v807_v15 = vpop.f32.mrf.mxu3 }
 0x572   :  { %844 = vrot.lane.b32.xlu1 %v806_v8, %s1829_s21  ;;  %v808_v17 = vadd.f32 %v1745_v32, %v807_v15 }
 0x574   :  { %v2164_v35 = vpack.c.bf16 %v808_v17, %v808_v17 }
 0x575   :  { %847 = vrot.lane.b32.xlu0 %v806_v8, %s1830_s0 }
 0x576   :  { %v953_v24 = vsel %vm158_vm1, %v2164_v35, 0 }
 0x577   :  { %962 = vmatpush.bf16.xpose.msra.mxu0 %v953_v24 }
 0x57d   :  { %850 = vrot.lane.b32.xlu0 %v806_v8, %s1828_s4 }
 0x585   :  { %857 = vrot.lane.b32.xlu0 %v808_v17, %s1830_s0 }
 0x5cc   :  { %v699_v0 = vpop.xlane.xlu1 %698 }
 0x5cd   :  { %v703_v1 = vmul.f32 %v699_v0, %v2141_v53 }
 0x5cf   :  { %v705_v28 = vadd.f32 1e-05, %v703_v1 }
 0x5d1   :  { %1784 = vrsqrt.f32 %v705_v28  ;;  %vm713_vm7 = vweird.f32 %v705_v28 }
 0x5d4   :  { %v702_v6 = vpop.xlane.xlu0 %701 }
 0x5d5   :  { %v704_v7 = vmul.f32 %v702_v6, %v2141_v53  ;;  %v77_v6 = vld [vmem:[%s2413_s3] sm:$0x1] }
 0x5d7   :  { %v1785_v9 = vpop.eup %1784  ;;  %v706_v10 = vadd.f32 1e-05, %v704_v7  ;;  %v79_v7 = vunpack.c.l.bf16 %v77_v6 }
 0x5d8   :  { %v708_v12 = vmul.f32 %v1785_v9, %v705_v28  ;;  %vm714_vm6 = vweird.f32 %v1785_v9 }
 0x5d9   :  { %1786 = vrsqrt.f32 %v706_v10  ;;  %vm715_vm8 = vmor %vm713_vm7, %vm714_vm6  ;;  %vm723_vm10 = vweird.f32 %v706_v10 }
 0x5da   :  { %v709_v14 = vmul.f32 %v1785_v9, %v708_v12 }
 0x5dc   :  { %v710_v16 = vmul.f32 0.5, %v709_v14 }
 0x5de   :  { %v711_v18 = vsub.f32 1.5, %v710_v16 }
 0x5df   :  { %v1787_v21 = vpop.eup %1786 }
 0x5e0   :  { %v712_v22 = vmul.f32 %v1785_v9, %v711_v18  ;;  %v718_v23 = vmul.f32 %v1787_v21, %v706_v10  ;;  %vm724_vm9 = vweird.f32 %v1787_v21  ;;  %v871_v10 = vperm.slane %v79_v7, 0 }
 0x5e1   :  { %vm725_vm11 = vmor %vm723_vm10, %vm724_vm9 }
 0x5e2   :  { %v719_v39 = vmul.f32 %v1787_v21, %v718_v23  ;;  %v716_v26 = vsel %vm715_vm8, %v1785_v9, %v712_v22  ;;  %v78_v22 = vld [vmem:[%s2413_s3 + $0x1] sm:$0x1] }
 0x5e3   :  { %v727_v33 = vmul.f32 %v716_v26, %v693_v56  ;;  %v80_v24 = vunpack.c.l.bf16 %v78_v22 }
 0x5e4   :  { %v720_v27 = vmul.f32 0.5, %v719_v39  ;;  %v845_v46 = vpop.permute.xlu1 %844 }
 0x5e5   :  { %v730_v41 = vmul.f32 %v729_v31, %v727_v33  ;;  %v2191_v36 = vpack.c.bf16 %v845_v46, %v845_v46 }
 0x5e6   :  { %v721_v30 = vsub.f32 1.5, %v720_v27  ;;  %v872_v27 = vperm.slane %v80_v24, 0 }
 0x5e7   :  { %v2182_v44 = vadd.f32 %v732_v40, %v730_v41  ;;  %v848_v29 = vpop.permute.xlu0 %847  ;;  %v896_v3 = vsel %vm158_vm1, %v2191_v36, 0 }
 0x5e8   :  { %v722_v37 = vmul.f32 %v1787_v21, %v721_v30  ;;  %v2189_v47 = vpack.c.bf16 %v848_v29, %v848_v29  ;;  %905 = vmatpush.bf16.xpose.msrb.mxu1 %v896_v3 }
 0x5ea   :  { %v726_v38 = vsel %vm725_vm11, %v1787_v21, %v722_v37  ;;  %v915_v2 = vsel %vm158_vm1, %v2189_v47, 0 }
 0x5eb   :  { %v728_v42 = vmul.f32 %v726_v38, %v694_v61  ;;  %924 = vmatpush.bf16.xpose.msrb.mxu2 %v915_v2 }
 0x5ed   :  { %v731_v43 = vmul.f32 %v729_v31, %v728_v42 }
 0x5ef   :  { %v2184_v45 = vadd.f32 %v732_v40, %v731_v43  ;;  %v851_v52 = vpop.permute.xlu0 %850 }
 0x5f0   :  { %v2202_v54 = vpack.c.bf16 %v851_v52, %v851_v52 }
 0x5f1   :  { %v735_v19 = vpack.c.bf16 %v2184_v45, %v2182_v44 }
 0x5f2   :  { %v934_v55 = vsel %vm158_vm1, %v2202_v54, 0 }
 0x5f3   :  { %1623 = vmatmul.msk.bf16.vlgmr.msra.gmra.mxu2 %vm102_vm0, %v735_v19  ;;  %943 = vmatpush.bf16.xpose.msrb.mxu3 %v934_v55 }
 0x5f7   :  { %v858_v59 = vpop.permute.xlu0 %857 }
 0x5f8   :  { %v2214_v60 = vpack.c.bf16 %v858_v59, %v858_v59 }
 0x5fa   :  { %v991_v61 = vsel %vm158_vm1, %v2214_v60, 0 }
 0x5fb   :  { %1000 = vmatpush.bf16.xpose.msra.mxu2 %v991_v61 }
 0x676   :  { %v768_v49 = vpop.f32.mrf.mxu2 }
 0x677   :  { %v769_v50 = vadd.f32 %v1746_v48, %v768_v49 }
 0x679   :  { %v835_v51 = vpack.c.bf16 %v769_v50, %v769_v50  ;;  %822 = vrot.lane.b32.xlu0 %v769_v50, %s1828_s4  ;;  %819 = vrot.lane.b32.xlu2 %v769_v50, %s1830_s0 }
 0x67b   :  { %1633 = vmatmul.msk.bf16.vlgmr.msrb.gmra.mxu0 %vm158_vm1, %v835_v51 }
 0x67e   :  { %v770_v56 = vpop.f32.mrf.mxu2 }
 0x67f   :  { %v771_v57 = vadd.f32 %v1746_v48, %v770_v56  ;;  %v1170_v48 = vunpack.c.l.b16 %v2189_v47 }
 0x681   :  { %832 = vrot.lane.b32.xlu1 %v771_v57, %s1828_s4  ;;  %860 = vrot.lane.b32.xlu0 %v808_v17, %s1828_s4  ;;  %v839_v58 = vpack.c.bf16 %v771_v57, %v771_v57  ;;  %v1171_v3 = vpack.c.b16 %v1170_v48, %v1170_v48 }
 0x682   :  { %816 = vrot.lane.b32.xlu2 %v769_v50, %s1829_s21 }
 0x689   :  { %829 = vrot.lane.b32.xlu0 %v771_v57, %s1830_s0 }
 0x68a   :  { %854 = vrot.lane.b32.xlu2 %v808_v17, %s1829_s21 }
 0x68b   :  { %1637 = vmatmul.msk.bf16.vlgmr.msra.gmra.mxu0 %vm158_vm1, %v839_v58 }
 0x691   :  { %826 = vrot.lane.b32.xlu0 %v771_v57, %s1829_s21 }
 0x6d3   :  { %v820_v62 = vpop.permute.xlu2 %819 }
 0x6d4   :  { %v837_v63 = vpack.c.bf16 %v820_v62, %v820_v62 }
 0x6d6   :  { %1635 = vmatmul.msk.bf16.vlgmr.msrb.gmra.mxu2 %vm158_vm1, %v837_v63 }
 0x6dc   :  { %v817_v20 = vpop.permute.xlu2 %816 }
 0x6dd   :  { %v836_v0 = vpack.c.bf16 %v817_v20, %v817_v20  ;;  %v1146_v20 = vunpack.c.l.b16 %v2191_v36 }
 0x6df   :  { %1634 = vmatmul.msk.bf16.vlgmr.msrb.gmra.mxu1 %vm158_vm1, %v836_v0  ;;  %v1194_v0 = vunpack.c.l.b16 %v2202_v54 }
 0x6e4   :  { %v855_v1 = vpop.permute.xlu2 %854 }
 0x6e5   :  { %v2220_v28 = vpack.c.bf16 %v855_v1, %v855_v1 }
 0x6e7   :  { %v972_v4 = vsel %vm158_vm1, %v2220_v28, 0 }
 0x6e8   :  { %981 = vmatpush.bf16.xpose.msra.mxu1 %v972_v4  ;;  %v1147_v4 = vpack.c.b16 %v1146_v20, %v1146_v20 }
 0x6eb   :  { %v823_v32 = vpop.permute.xlu0 %822 }
 0x6ec   :  { %v838_v5 = vpack.c.bf16 %v823_v32, %v823_v32  ;;  %v1195_v32 = vpack.c.b16 %v1194_v0, %v1194_v0 }
 0x6ee   :  { %1636 = vmatmul.msk.bf16.vlgmr.msrb.gmra.mxu3 %vm158_vm1, %v838_v5 }
 0x6f3   :  { %v861_v8 = vpop.permute.xlu0 %860  ;;  %v833_v14 = vpop.permute.xlu1 %832 }
 0x6f4   :  { %v2228_v9 = vpack.c.bf16 %v861_v8, %v861_v8  ;;  %v842_v18 = vpack.c.bf16 %v833_v14, %v833_v14 }
 0x6f6   :  { %v1010_v12 = vsel %vm158_vm1, %v2228_v9, 0 }
 0x6f7   :  { %1019 = vmatpush.bf16.xpose.msra.mxu3 %v1010_v12 }
 0x6f8   :  { %v888_v13 = vpop.f32.mrf.mxu0 }
 0x6f9   :  { %v2232_v15 = vadd.f32 %v888_v13, %v871_v10 }
 0x6fb   :  { %v830_v16 = vpop.permute.xlu0 %829  ;;  %v1025_v17 = vsel %vm158_vm1, %v2232_v15, -inf }
 0x6fc   :  { %v841_v21 = vpack.c.bf16 %v830_v16, %v830_v16  ;;  %1026 = vmax.xlane.f32.xlu1 %v1025_v17 }
 0x6fe   :  { %1639 = vmatmul.msk.bf16.vlgmr.msra.gmra.mxu2 %vm158_vm1, %v841_v21  ;;  %1640 = vmatmul.msk.bf16.vlgmr.msra.gmra.mxu3 %vm158_vm1, %v842_v18 }
 0x700   :  { %v890_v23 = vpop.f32.mrf.mxu0 }
 0x703   :  { %v827_v39 = vpop.permute.xlu0 %826 }
 0x704   :  { %v840_v26 = vpack.c.bf16 %v827_v39, %v827_v39 }
 0x706   :  { %1638 = vmatmul.msk.bf16.vlgmr.msra.gmra.mxu1 %vm158_vm1, %v840_v26 }
 0x708   :  { %v964_v30 = vpop.f32.mrf.mxu0 }
 0x709   :  { %v2242_v31 = vadd.f32 %v964_v30, %v872_v27 }
 0x70b   :  { %v1037_v33 = vsel %vm158_vm1, %v2242_v31, -inf }
 0x70c   :  { %1038 = vmax.xlane.f32.xlu2 %v1037_v33 }
 0x710   :  { %v966_v37 = vpop.f32.mrf.mxu0 }
 0x759   :  { %v926_v38 = vpop.f32.mrf.mxu2 }
 0x75a   :  { %v927_v40 = vadd.f32 %v926_v38, %v871_v10 }
 0x75c   :  { %v907_v41 = vpop.f32.mrf.mxu1  ;;  %v1031_v42 = vsel %vm158_vm1, %v927_v40, -inf }
 0x75d   :  { %v908_v43 = vadd.f32 %v907_v41, %v871_v10  ;;  %1032 = vmax.xlane.f32.xlu1 %v1031_v42 }
 0x75f   :  { %v1028_v19 = vsel %vm158_vm1, %v908_v43, -inf }
 0x760   :  { %1029 = vmax.xlane.f32.xlu0 %v1028_v19 }
 0x761   :  { %v928_v29 = vpop.f32.mrf.mxu2 }
 0x764   :  { %v909_v46 = vpop.f32.mrf.mxu1 }
 0x76f   :  { %v1027_v6 = vpop.xlane.xlu1 %1026 }
 0x771   :  { %v945_v2 = vpop.f32.mrf.mxu3 }
 0x772   :  { %v946_v49 = vadd.f32 %v945_v2, %v871_v10 }
 0x774   :  { %1172 = vrot.lane.b32.xlu0 %v1171_v3, %s1831_s22  ;;  %v1034_v50 = vsel %vm158_vm1, %v946_v49, -inf }
 0x775   :  { %1035 = vmax.xlane.f32.xlu2 %v1034_v50 }
 0x779   :  { %v947_v51 = vpop.f32.mrf.mxu3 }
 0x77a   :  { %v1266_v51 = vunpack.c.l.b16 %v2214_v60  ;;  %v1049_v60 = vsub.f32 %v2232_v15, %v1027_v6 }
 0x77f   :  { %v1039_v18 = vpop.xlane.xlu2 %1038 }
 0x781   :  { %v1002_v52 = vpop.f32.mrf.mxu2  ;;  %v1021_v55 = vpop.f32.mrf.mxu3 }
 0x782   :  { %v1003_v56 = vadd.f32 %v1002_v52, %v872_v27  ;;  %v1022_v57 = vadd.f32 %v1021_v55, %v872_v27  ;;  %v1267_v55 = vpack.c.b16 %v1266_v51, %v1266_v51 }
 0x783   :  { %v983_v58 = vpop.f32.mrf.mxu1 }
 0x784   :  { %v1046_v59 = vsel %vm158_vm1, %v1022_v57, -inf  ;;  %v1043_v61 = vsel %vm158_vm1, %v1003_v56, -inf  ;;  %v984_v1 = vadd.f32 %v983_v58, %v872_v27 }
 0x785   :  { %1047 = vmax.xlane.f32.xlu2 %v1046_v59  ;;  %1044 = vmax.xlane.f32.xlu1 %v1043_v61  ;;  %v1290_v61 = vunpack.c.l.b16 %v2228_v9  ;;  %v1218_v9 = vunpack.c.l.b16 %v2164_v35 }
 0x786   :  { %v1040_v5 = vsel %vm158_vm1, %v984_v1, -inf }
 0x789   :  { %v1004_v47 = vpop.f32.mrf.mxu2  ;;  %v1023_v62 = vpop.f32.mrf.mxu3 }
 0x78a   :  { %v1291_v47 = vpack.c.b16 %v1290_v61, %v1290_v61  ;;  %v1057_v62 = vmul.f32 1.442695, %v1049_v60 }
 0x78b   :  { %v985_v63 = vpop.f32.mrf.mxu1 }
 0x78c   :  { %v1053_v63 = vsub.f32 %v2242_v31, %v1039_v18  ;;  %v1219_v31 = vpack.c.b16 %v1218_v9, %v1218_v9 }
 0x78e   :  { %v1065_v20 = vmul.f32 1.442695, %v1053_v63 }
 0x79d   :  { %1148 = vrot.lane.b32.xlu2 %v1147_v4, %s1831_s22 }
 0x79e   :  { %1041 = vmax.xlane.f32.xlu0 %v1040_v5  ;;  %1196 = vrot.lane.b32.xlu1 %v1195_v32, %s1831_s22 }
 0x7d0   :  { %v1033_v7 = vpop.xlane.xlu1 %1032 }
 0x7d1   :  { %v1051_v8 = vsub.f32 %v927_v40, %v1033_v7 }
 0x7d3   :  { %v1061_v10 = vmul.f32 1.442695, %v1051_v8  ;;  %v1030_v12 = vpop.xlane.xlu0 %1029 }
 0x7d4   :  { %v1050_v13 = vsub.f32 %v908_v43, %v1030_v12 }
 0x7d5   :  { %1788 = vpow2.f32 %v1061_v10 }
 0x7d6   :  { %v1059_v36 = vmul.f32 1.442695, %v1050_v13 }
 0x7d8   :  { %1790 = vpow2.f32 %v1059_v36 }
 0x7db   :  { %v2258_v54 = vpop.eup %1788 }
 0x7dc   :  { %v1079_v14 = vsel %vm158_vm1, %v2258_v54, 0.0 }
 0x7dd   :  { %1080 = vadd.xlane.f32.xlu2 %v1079_v14 }
 0x7de   :  { %v2262_v16 = vpop.eup %1790 }
 0x7df   :  { %v1076_v17 = vsel %vm158_vm1, %v2262_v16, 0.0 }
 0x7e0   :  { %1077 = vadd.xlane.f32.xlu1 %v1076_v17 }
 0x7e6   :  { %v1173_v21 = vpop.permute.xlu0 %1172 }
 0x7e7   :  { %v1178_v22 = vsel %vm447_vm2, %v1173_v21, 0 }
 0x7e8   :  { %1187 = vmatpush.bf16.msrb.mxu2 %v1178_v22  ;;  %v1036_v23 = vpop.xlane.xlu2 %1035 }
 0x7e9   :  { %v1052_v24 = vsub.f32 %v946_v49, %v1036_v23 }
 0x7eb   :  { %v1063_v39 = vmul.f32 1.442695, %v1052_v24 }
 0x7ed   :  { %1792 = vpow2.f32 %v1063_v39 }
 0x7f3   :  { %v2267_v26 = vpop.eup %1792 }
 0x7f4   :  { %v1082_v27 = vsel %vm158_vm1, %v2267_v26, 0.0 }
 0x7f5   :  { %1083 = vadd.xlane.f32.xlu0 %v1082_v27 }
 0x7f8   :  { %v1048_v30 = vpop.xlane.xlu2 %1047  ;;  %v1045_v33 = vpop.xlane.xlu1 %1044 }
 0x7f9   :  { %v1056_v37 = vsub.f32 %v1022_v57, %v1048_v30  ;;  %v1055_v38 = vsub.f32 %v1003_v56, %v1045_v33  ;;  %v1242_v56 = vunpack.c.l.b16 %v2220_v28  ;;  %v1122_v28 = vunpack.c.l.b16 %v2160_v11 }
 0x7fb   :  { %v1071_v40 = vmul.f32 1.442695, %v1056_v37  ;;  %v1069_v41 = vmul.f32 1.442695, %v1055_v38  ;;  %v1243_v58 = vpack.c.b16 %v1242_v56, %v1242_v56  ;;  %v1123_v0 = vpack.c.b16 %v1122_v28, %v1122_v28 }
 0x7fd   :  { %1794 = vpow2.f32 %v1071_v40 }
 0x7fe   :  { %1796 = vpow2.f32 %v1069_v41 }
 0x800   :  { %v1149_v42 = vpop.permute.xlu2 %1148 }
 0x801   :  { %v1154_v43 = vsel %vm447_vm2, %v1149_v42, 0 }
 0x802   :  { %1163 = vmatpush.bf16.msrb.mxu1 %v1154_v43 }
 0x803   :  { %v2272_v19 = vpop.eup %1794 }
 0x804   :  { %v2274_v29 = vpop.eup %1796  ;;  %v1094_v46 = vsel %vm158_vm1, %v2272_v19, 0.0 }
 0x805   :  { %v1091_v48 = vsel %vm158_vm1, %v2274_v29, 0.0  ;;  %1095 = vadd.xlane.f32.xlu1 %v1094_v46 }
 0x806   :  { %1092 = vadd.xlane.f32.xlu0 %v1091_v48 }
 0x810   :  { %v1197_v2 = vpop.permute.xlu1 %1196 }
 0x811   :  { %v1202_v3 = vsel %vm447_vm2, %v1197_v2, 0  ;;  %v1042_v49 = vpop.xlane.xlu0 %1041 }
 0x812   :  { %v1054_v50 = vsub.f32 %v984_v1, %v1042_v49  ;;  %1211 = vmatpush.bf16.msrb.mxu3 %v1202_v3 }
 0x814   :  { %v1067_v52 = vmul.f32 1.442695, %v1054_v50 }
 0x816   :  { %1798 = vpow2.f32 %v1067_v52 }
 0x817   :  { %1800 = vpow2.f32 %v1057_v62 }
 0x818   :  { %1802 = vpow2.f32 %v1065_v20 }
 0x81a   :  { %1268 = vrot.lane.b32.xlu0 %v1267_v55, %s1831_s22 }
 0x81c   :  { %v2284_v57 = vpop.eup %1798 }
 0x81d   :  { %v1088_v59 = vsel %vm158_vm1, %v2284_v57, 0.0  ;;  %v2295_v1 = vpop.eup %1800 }
 0x81e   :  { %1089 = vadd.xlane.f32.xlu2 %v1088_v59  ;;  %1244 = vrot.lane.b32.xlu1 %v1243_v58, %s1831_s22  ;;  %v1073_v15 = vsel %vm158_vm1, %v2295_v1, 0.0  ;;  %v2300_v4 = vpop.eup %1802 }
 0x81f   :  { %v1085_v11 = vsel %vm158_vm1, %v2300_v4, 0.0 }
 0x836   :  { %1292 = vrot.lane.b32.xlu2 %v1291_v47, %s1831_s22 }
 0x83e   :  { %1124 = vrot.lane.b32.xlu2 %v1123_v0, %s1831_s22 }
 0x844   :  { %1074 = vadd.xlane.f32.xlu0 %v1073_v15 }
 0x846   :  { %1220 = vrot.lane.b32.xlu2 %v1219_v31, %s1831_s22 }
 0x848   :  { %1086 = vadd.xlane.f32.xlu1 %v1085_v11 }
 0x850   :  { %v1081_v32 = vpop.xlane.xlu2 %1080 }
 0x851   :  { %1804 = vrcp.f32 %v1081_v32 }
 0x853   :  { %v1078_v5 = vpop.xlane.xlu1 %1077 }
 0x854   :  { %1806 = vrcp.f32 %v1078_v5 }
 0x857   :  { %v1805_v6 = vpop.eup %1804 }
 0x858   :  { %v1107_v35 = vmul.f32 %v1805_v6, %v2258_v54  ;;  %v1693_v6 = vld [vmem:[%s2415_s12 + $0x8] sm:$0xff] }
 0x85a   :  { %v1807_v7 = vpop.eup %1806  ;;  %v1115_v8 = vpack.c.bf16 %v1107_v35, %v1107_v35  ;;  %v1692_v35 = vld [vmem:[%s2415_s12] sm:$0xff] }
 0x85b   :  { %v1106_v10 = vmul.f32 %v1807_v7, %v2262_v16 }
 0x85c   :  { %1643 = vmatmul.msk.bf16.vlgmr.msrb.gmra.mxu2 %vm158_vm1, %v1115_v8 }
 0x85d   :  { %v1114_v12 = vpack.c.bf16 %v1106_v10, %v1106_v10 }
 0x85f   :  { %1642 = vmatmul.msk.bf16.vlgmr.msrb.gmra.mxu1 %vm158_vm1, %v1114_v12 }
 0x868   :  { %v1084_v13 = vpop.xlane.xlu0 %1083 }
 0x869   :  { %1808 = vrcp.f32 %v1084_v13 }
 0x86f   :  { %v1809_v36 = vpop.eup %1808 }
 0x870   :  { %v1108_v14 = vmul.f32 %v1809_v36, %v2267_v26 }
 0x872   :  { %v1116_v17 = vpack.c.bf16 %v1108_v14, %v1108_v14 }
 0x874   :  { %1644 = vmatmul.msk.bf16.vlgmr.msrb.gmra.mxu3 %vm158_vm1, %v1116_v17 }
 0x878   :  { %v1096_v21 = vpop.xlane.xlu1 %1095 }
 0x879   :  { %v1093_v18 = vpop.xlane.xlu0 %1092 }
 0x87a   :  { %1810 = vrcp.f32 %v1093_v18 }
 0x87b   :  { %1812 = vrcp.f32 %v1096_v21 }
 0x880   :  { %v1811_v54 = vpop.eup %1810 }
 0x881   :  { %v1111_v22 = vmul.f32 %v1811_v54, %v2274_v29  ;;  %v1813_v26 = vpop.eup %1812 }
 0x882   :  { %v1112_v37 = vmul.f32 %v1813_v26, %v2272_v19 }
 0x883   :  { %v1119_v24 = vpack.c.bf16 %v1111_v22, %v1111_v22 }
 0x884   :  { %v1120_v43 = vpack.c.bf16 %v1112_v37, %v1112_v37 }
 0x88c   :  { %v1269_v16 = vpop.permute.xlu0 %1268 }
 0x88d   :  { %v1274_v23 = vsel %vm447_vm2, %v1269_v16, 0 }
 0x88e   :  { %1283 = vmatpush.bf16.msra.mxu2 %v1274_v23 }
 0x890   :  { %v1245_v39 = vpop.permute.xlu1 %1244 }
 0x891   :  { %v1250_v27 = vsel %vm447_vm2, %v1245_v39, 0  ;;  %v1090_v30 = vpop.xlane.xlu2 %1089  ;;  %1647 = vmatmul.msk.bf16.vlgmr.msra.gmra.mxu2 %vm158_vm1, %v1119_v24 }
 0x892   :  { %1814 = vrcp.f32 %v1090_v30  ;;  %1259 = vmatpush.bf16.msra.mxu1 %v1250_v27  ;;  %v1747_v27 = vld [vmem:[%s2414_s13] ss:$0 sm:$0xff] }
 0x898   :  { %v1815_v33 = vpop.eup %1814 }
 0x899   :  { %v1110_v38 = vmul.f32 %v1815_v33, %v2284_v57  ;;  %v1293_v40 = vpop.permute.xlu2 %1292 }
 0x89a   :  { %v1298_v41 = vsel %vm447_vm2, %v1293_v40, 0 }
 0x89b   :  { %v1118_v42 = vpack.c.bf16 %v1110_v38, %v1110_v38  ;;  %1307 = vmatpush.bf16.msra.mxu3 %v1298_v41 }
 0x89d   :  { %1646 = vmatmul.msk.bf16.vlgmr.msra.gmra.mxu1 %vm158_vm1, %v1118_v42 }
 0x89e   :  { %1648 = vmatmul.msk.bf16.vlgmr.msra.gmra.mxu3 %vm158_vm1, %v1120_v43 }
 0x8a1   :  { %v1125_v29 = vpop.permute.xlu2 %1124 }
 0x8a2   :  { %v1130_v46 = vsel %vm447_vm2, %v1125_v29, 0 }
 0x8a3   :  { %1139 = vmatpush.bf16.msrb.mxu0 %v1130_v46 }
 0x8a9   :  { %v1221_v48 = vpop.permute.xlu2 %1220 }
 0x8aa   :  { %v1226_v2 = vsel %vm447_vm2, %v1221_v48, 0 }
 0x8ab   :  { %1235 = vmatpush.bf16.msra.mxu0 %v1226_v2 }
 0x8b7   :  { %v1075_v19 = vpop.xlane.xlu0 %1074 }
 0x8b8   :  { %1816 = vrcp.f32 %v1075_v19 }
 0x8bb   :  { %v1087_v51 = vpop.xlane.xlu1 %1086 }
 0x8bc   :  { %1818 = vrcp.f32 %v1087_v51 }
 0x8be   :  { %v1817_v3 = vpop.eup %1816 }
 0x8bf   :  { %v1105_v49 = vmul.f32 %v1817_v3, %v2295_v1 }
 0x8c1   :  { %v1113_v50 = vpack.c.bf16 %v1105_v49, %v1105_v49 }
 0x8c2   :  { %v1819_v52 = vpop.eup %1818 }
 0x8c3   :  { %1641 = vmatmul.msk.bf16.vlgmr.msrb.gmra.mxu0 %vm158_vm1, %v1113_v50  ;;  %v1109_v55 = vmul.f32 %v1819_v52, %v2300_v4 }
 0x8c4   :  { %1368 = vmatpush.bf16.msrb.mxu0 %v1693_v6  ;;  %v1425_v6 = vperm.slane %v2179_v34, 1 }
 0x8c5   :  { %v1117_v56 = vpack.c.bf16 %v1109_v55, %v1109_v55  ;;  %v1694_v55 = vld [vmem:[%s2417_s14] sm:$0xff] }
 0x8c8   :  { %1369 = vmatpush.bf16.msrb.mxu0 %v1692_v35 }
 0x8d3   :  { %1645 = vmatmul.msk.bf16.vlgmr.msra.gmra.mxu0 %vm158_vm1, %v1117_v56 }
 0x8dc   :  { %v1165_v57 = vpop.f32.mrf.mxu1 }
 0x8df   :  { %v1189_v58 = vpop.f32.mrf.mxu2 }
 0x8e4   :  { %v1167_v59 = vpop.f32.mrf.mxu1 }
 0x8e7   :  { %v1191_v61 = vpop.f32.mrf.mxu2 }
 0x8f7   :  { %v1213_v60 = vpop.f32.mrf.mxu3 }
 0x8ff   :  { %v1215_v47 = vpop.f32.mrf.mxu3 }
 0x914   :  { %v1285_v62 = vpop.f32.mrf.mxu2 }
 0x915   :  { %v1733_v15 = vpack.i.bf16 %v1285_v62, %v1189_v58 }
 0x91a   :  { %v1261_v63 = vpop.f32.mrf.mxu1 }
 0x91b   :  { %v1728_v28 = vpack.i.bf16 %v1261_v63, %v1165_v57 }
 0x91c   :  { %v1287_v20 = vpop.f32.mrf.mxu2 }
 0x91d   :  { %1729 = vrot.lane.b32.xlu2 %v1728_v28, %s1833_s2 }
 0x921   :  { %v1309_v0 = vpop.f32.mrf.mxu3 }
 0x922   :  { %v1738_v1 = vpack.i.bf16 %v1309_v0, %v1213_v60  ;;  %v1263_v9 = vpop.f32.mrf.mxu1 }
 0x924   :  { %1739 = vrot.lane.b32.xlu0 %v1738_v1, %s1835_s27 }
 0x925   :  { %1734 = vrot.lane.b32.xlu2 %v1733_v15, %s1834_s26 }
 0x929   :  { %v1311_v4 = vpop.f32.mrf.mxu3 }
 0x940   :  { %v1141_v31 = vpop.f32.mrf.mxu0 }
 0x948   :  { %v1143_v11 = vpop.f32.mrf.mxu0 }
 0x950   :  { %v1237_v32 = vpop.f32.mrf.mxu0 }
 0x958   :  { %v1239_v5 = vpop.f32.mrf.mxu0 }
 0x977   :  { %v1730_v7 = vpop.permute.xlu2 %1729 }
 0x978   :  { %v1732_v10 = vunpack.i.h.bf16 %v1730_v7  ;;  %v1731_v12 = vunpack.i.l.bf16 %v1730_v7 }
 0x97a   :  { %v1325_v17 = vsel %vm158_vm1, %v1141_v31, %v1731_v12  ;;  %v1340_v18 = vsel %vm158_vm1, %v1237_v32, %v1732_v10  ;;  %v1422_v31 = vperm.slane %v2172_v25, 1 }
 0x97f   :  { %v1735_v8 = vpop.permute.xlu2 %1734 }
 0x980   :  { %v1737_v13 = vunpack.i.h.bf16 %v1735_v8  ;;  %v1736_v36 = vunpack.i.l.bf16 %v1735_v8 }
 0x982   :  { %v1326_v22 = vsel %vm624_vm3, %v1325_v17, %v1736_v36  ;;  %v1341_v16 = vsel %vm624_vm3, %v1340_v18, %v1737_v13  ;;  %v1699_v36 = vld [vmem:[%s2419_s16 + $0x18] sm:$0xff]  ;;  %v1697_v17 = vld [vmem:[%s2419_s16 + $0x8] sm:$0xff]  ;;  %v1696_v18 = vld [vmem:[%s2419_s16] sm:$0xff]  ;;  %vm1505_vm3 = vcmask 523264  }
 0x983   :  { %1513 = vmatpush.bf16.msrb.mxu2 %v1699_v36 }
 0x996   :  { %v1740_v14 = vpop.permute.xlu0 %1739 }
 0x997   :  { %v1742_v54 = vunpack.i.h.bf16 %v1740_v14  ;;  %v1741_v21 = vunpack.i.l.bf16 %v1740_v14  ;;  %v1698_v14 = vld [vmem:[%s2419_s16 + $0x10] sm:$0xff] }
 0x998   :  { %1514 = vmatpush.bf16.msrb.mxu2 %v1698_v14 }
 0x999   :  { %v1342_v23 = vsel %vm626_vm4, %v1341_v16, %v1742_v54  ;;  %v1327_v24 = vsel %vm626_vm4, %v1326_v22, %v1741_v21  ;;  %v1748_v21 = vld [vmem:[%s2416_s15] ss:$0 sm:$0xff] }
 0x99a   :  { %v1343_v39 = vpack.c.bf16 %v1342_v23, %v1327_v24 }
 0x99c   :  { %1657 = vmatmul.msk.bf16.vlgmr.msrb.gmra.mxu0 %vm102_vm0, %v1343_v39  ;;  %1515 = vmatpush.bf16.msrb.mxu2 %v1697_v17 }
 0x9a0   :  { %1516 = vmatpush.bf16.msrb.mxu2 %v1696_v18 }
 0xa19   :  { %v1371_v30 = vpop.f32.mrf.mxu0 }
 0xa1a   :  { %v1372_v26 = vadd.f32 %v1747_v27, %v1371_v30  ;;  %v1749_v30 = vld [vmem:[%s2418_s17] ss:$0 sm:$0xff] }
 0xa1c   :  { %v1376_v33 = vadd.f32 %v1372_v26, %v2182_v44 }
 0xa1e   :  { %v1378_v37 = vsel %vm102_vm0, %v1376_v33, 0.0 }
 0xa1f   :  { %1379 = vadd.xlane.f32.xlu2 %v1378_v37 }
 0xa21   :  { %v1373_v38 = vpop.f32.mrf.mxu0 }
 0xa22   :  { %v1374_v40 = vadd.f32 %v1747_v27, %v1373_v38 }
 0xa24   :  { %v1377_v41 = vadd.f32 %v1374_v40, %v2184_v45  ;;  %v1695_v45 = vld [vmem:[%s2417_s14 + $0x8] sm:$0xff] }
 0xa25   :  { %1458 = vmatpush.bf16.msrb.mxu1 %v1695_v45 }
 0xa26   :  { %v1381_v42 = vsel %vm102_vm0, %v1377_v41, 0.0 }
 0xa27   :  { %1382 = vadd.xlane.f32.xlu1 %v1381_v42 }
 0xa29   :  { %1459 = vmatpush.bf16.msrb.mxu1 %v1694_v55 }
 0xa92   :  { %v1380_v43 = vpop.xlane.xlu2 %1379 }
 0xa93   :  { %v1384_v29 = vmul.f32 %v1380_v43, %v2141_v53 }
 0xa95   :  { %v1386_v46 = vsub.f32 %v1376_v33, %v1384_v29 }
 0xa97   :  { %v1388_v48 = vmul.f32 %v1386_v46, %v1386_v46 }
 0xa99   :  { %v1390_v2 = vsel %vm102_vm0, %v1388_v48, 0.0 }
 0xa9a   :  { %v1383_v19 = vpop.xlane.xlu1 %1382  ;;  %1391 = vadd.xlane.f32.xlu0 %v1390_v2 }
 0xa9b   :  { %v1385_v44 = vmul.f32 %v1383_v19, %v2141_v53 }
 0xa9d   :  { %v1387_v3 = vsub.f32 %v1377_v41, %v1385_v44 }
 0xa9f   :  { %v1389_v49 = vmul.f32 %v1387_v3, %v1387_v3 }
 0xaa1   :  { %v1393_v50 = vsel %vm102_vm0, %v1389_v49, 0.0 }
 0xaa2   :  { %1394 = vadd.xlane.f32.xlu1 %v1393_v50 }
 0xb0d   :  { %v1392_v51 = vpop.xlane.xlu0 %1391 }
 0xb0e   :  { %v1396_v52 = vmul.f32 %v1392_v51, %v2141_v53 }
 0xb10   :  { %v1398_v56 = vadd.f32 1e-05, %v1396_v52 }
 0xb12   :  { %1820 = vrsqrt.f32 %v1398_v56  ;;  %vm1406_vm13 = vweird.f32 %v1398_v56 }
 0xb15   :  { %v1395_v57 = vpop.xlane.xlu1 %1394 }
 0xb16   :  { %v1397_v58 = vmul.f32 %v1395_v57, %v2141_v53 }
 0xb18   :  { %v1821_v59 = vpop.eup %1820  ;;  %v1399_v61 = vadd.f32 1e-05, %v1397_v58 }
 0xb19   :  { %v1401_v60 = vmul.f32 %v1821_v59, %v1398_v56  ;;  %vm1407_vm12 = vweird.f32 %v1821_v59 }
 0xb1a   :  { %1822 = vrsqrt.f32 %v1399_v61  ;;  %vm1408_vm14 = vmor %vm1406_vm13, %vm1407_vm12  ;;  %vm1416_vm1 = vweird.f32 %v1399_v61 }
 0xb1b   :  { %v1402_v47 = vmul.f32 %v1821_v59, %v1401_v60 }
 0xb1d   :  { %v1403_v62 = vmul.f32 0.5, %v1402_v47 }
 0xb1f   :  { %v1404_v63 = vsub.f32 1.5, %v1403_v62 }
 0xb20   :  { %v1823_v28 = vpop.eup %1822 }
 0xb21   :  { %v1405_v20 = vmul.f32 %v1821_v59, %v1404_v63  ;;  %v1411_v0 = vmul.f32 %v1823_v28, %v1399_v61  ;;  %vm1417_vm15 = vweird.f32 %v1823_v28 }
 0xb22   :  { %vm1418_vm2 = vmor %vm1416_vm1, %vm1417_vm15 }
 0xb23   :  { %v1412_v1 = vmul.f32 %v1823_v28, %v1411_v0  ;;  %v1409_v9 = vsel %vm1408_vm14, %v1821_v59, %v1405_v20  ;;  %v1569_v0 = vperm.slane %v2172_v25, 2 }
 0xb24   :  { %v1420_v11 = vmul.f32 %v1409_v9, %v1386_v46 }
 0xb25   :  { %v1413_v15 = vmul.f32 0.5, %v1412_v1 }
 0xb26   :  { %v1423_v35 = vmul.f32 %v1422_v31, %v1420_v11 }
 0xb27   :  { %v1414_v4 = vsub.f32 1.5, %v1413_v15  ;;  %v1572_v15 = vperm.slane %v2179_v34, 2 }
 0xb28   :  { %v1426_v10 = vadd.f32 %v1425_v6, %v1423_v35 }
 0xb29   :  { %v1415_v32 = vmul.f32 %v1823_v28, %v1414_v4 }
 0xb2b   :  { %v1419_v5 = vsel %vm1418_vm2, %v1823_v28, %v1415_v32 }
 0xb2c   :  { %v1421_v7 = vmul.f32 %v1419_v5, %v1387_v3 }
 0xb2e   :  { %v1424_v8 = vmul.f32 %v1422_v31, %v1421_v7 }
 0xb30   :  { %v1427_v12 = vadd.f32 %v1425_v6, %v1424_v8 }
 0xb32   :  { %v1428_v13 = vpack.c.bf16 %v1427_v12, %v1426_v10 }
 0xb34   :  { %1666 = vmatmul.msk.bf16.vlgmr.msrb.gmra.mxu1 %vm102_vm0, %v1428_v13 }
 0xbb1   :  { %v1461_v54 = vpop.f32.mrf.mxu1 }
 0xbb2   :  { %v1462_v22 = vadd.f32 %v1748_v21, %v1461_v54 }
 0xbb4   :  { %v1466_v24 = vmax.f32 %v1462_v22, 0.0 }
 0xbb9   :  { %v1463_v16 = vpop.f32.mrf.mxu1 }
 0xbba   :  { %v1464_v23 = vadd.f32 %v1748_v21, %v1463_v16 }
 0xbbc   :  { %v1467_v39 = vmax.f32 %v1464_v23, 0.0 }
 0xbbe   :  { %v1468_v27 = vpack.c.bf16 %v1467_v39, %v1466_v24 }
 0xbc0   :  { %1683 = vmatmul.msk.bf16.vlgmr.msrb.gmra.mxu2 %vm1505_vm3, %v1468_v27 }
 0xc43   :  { %v1518_v26 = vpop.f32.mrf.mxu2 }
 0xc44   :  { %v1519_v33 = vadd.f32 %v1749_v30, %v1518_v26 }
 0xc46   :  { %v1523_v37 = vadd.f32 %v1519_v33, %v1426_v10 }
 0xc48   :  { %v1525_v38 = vsel %vm102_vm0, %v1523_v37, 0.0 }
 0xc49   :  { %1526 = vadd.xlane.f32.xlu1 %v1525_v38 }
 0xc4b   :  { %v1520_v40 = vpop.f32.mrf.mxu2 }
 0xc4c   :  { %v1521_v41 = vadd.f32 %v1749_v30, %v1520_v40 }
 0xc4e   :  { %v1524_v42 = vadd.f32 %v1521_v41, %v1427_v12 }
 0xc50   :  { %v1528_v43 = vsel %vm102_vm0, %v1524_v42, 0.0 }
 0xc51   :  { %1529 = vadd.xlane.f32.xlu1 %v1528_v43 }
 0xcbc   :  { %v1527_v29 = vpop.xlane.xlu1 %1526 }
 0xcbd   :  { %v1531_v46 = vmul.f32 %v1527_v29, %v2141_v53 }
 0xcbf   :  { %v1533_v48 = vsub.f32 %v1523_v37, %v1531_v46 }
 0xcc1   :  { %v1535_v2 = vmul.f32 %v1533_v48, %v1533_v48 }
 0xcc3   :  { %v1537_v19 = vsel %vm102_vm0, %v1535_v2, 0.0 }
 0xcc4   :  { %1538 = vadd.xlane.f32.xlu2 %v1537_v19  ;;  %v1530_v44 = vpop.xlane.xlu1 %1529 }
 0xcc5   :  { %v1532_v3 = vmul.f32 %v1530_v44, %v2141_v53 }
 0xcc7   :  { %v1534_v49 = vsub.f32 %v1524_v42, %v1532_v3 }
 0xcc9   :  { %v1536_v50 = vmul.f32 %v1534_v49, %v1534_v49 }
 0xccb   :  { %v1540_v45 = vsel %vm102_vm0, %v1536_v50, 0.0 }
 0xccc   :  { %1541 = vadd.xlane.f32.xlu1 %v1540_v45 }
 0xd37   :  { %v1539_v51 = vpop.xlane.xlu2 %1538 }
 0xd38   :  { %v1543_v52 = vmul.f32 %v1539_v51, %v2141_v53 }
 0xd3a   :  { %v1545_v55 = vadd.f32 1e-05, %v1543_v52 }
 0xd3c   :  { %1824 = vrsqrt.f32 %v1545_v55  ;;  %vm1553_vm5 = vweird.f32 %v1545_v55 }
 0xd3f   :  { %v1542_v56 = vpop.xlane.xlu1 %1541 }
 0xd40   :  { %v1544_v57 = vmul.f32 %v1542_v56, %v2141_v53 }
 0xd42   :  { %v1825_v58 = vpop.eup %1824  ;;  %v1546_v59 = vadd.f32 1e-05, %v1544_v57 }
 0xd43   :  { %v1548_v61 = vmul.f32 %v1825_v58, %v1545_v55  ;;  %vm1554_vm4 = vweird.f32 %v1825_v58 }
 0xd44   :  { %1826 = vrsqrt.f32 %v1546_v59  ;;  %vm1555_vm6 = vmor %vm1553_vm5, %vm1554_vm4  ;;  %vm1563_vm8 = vweird.f32 %v1546_v59 }
 0xd45   :  { %v1549_v60 = vmul.f32 %v1825_v58, %v1548_v61 }
 0xd47   :  { %v1550_v47 = vmul.f32 0.5, %v1549_v60 }
 0xd49   :  { %v1551_v62 = vsub.f32 1.5, %v1550_v47 }
 0xd4a   :  { %v1827_v63 = vpop.eup %1826 }
 0xd4b   :  { %v1552_v28 = vmul.f32 %v1825_v58, %v1551_v62  ;;  %v1558_v20 = vmul.f32 %v1827_v63, %v1546_v59  ;;  %vm1564_vm7 = vweird.f32 %v1827_v63 }
 0xd4c   :  { %vm1565_vm9 = vmor %vm1563_vm8, %vm1564_vm7 }
 0xd4d   :  { %v1556_v1 = vsel %vm1555_vm6, %v1825_v58, %v1552_v28  ;;  %v1559_v9 = vmul.f32 %v1827_v63, %v1558_v20 }
 0xd4e   :  { %v1567_v53 = vmul.f32 %v1556_v1, %v1533_v48 }
 0xd4f   :  { %v1560_v4 = vmul.f32 0.5, %v1559_v9 }
 0xd50   :  { %v1570_v31 = vmul.f32 %v1569_v0, %v1567_v53 }
 0xd51   :  { %v1561_v11 = vsub.f32 1.5, %v1560_v4 }
 0xd52   :  { %v1573_v32 = vadd.f32 %v1572_v15, %v1570_v31 }
 0xd53   :  { %v1562_v5 = vmul.f32 %v1827_v63, %v1561_v11 }
 0xd54   :  { %1575 = vst.msk [vmem:[%s2420_s20] sm:$0xff] %vm102_vm0, %v1573_v32 }
 0xd55   :  { %v1566_v25 = vsel %vm1565_vm9, %v1827_v63, %v1562_v5 }
 0xd56   :  { %v1568_v6 = vmul.f32 %v1566_v25, %v1534_v49 }
 0xd58   :  { %v1571_v35 = vmul.f32 %v1569_v0, %v1568_v6 }
 0xd5a   :  { %v1574_v7 = vadd.f32 %v1572_v15, %v1571_v35 }
 0xd5c   :  { %1576 = vst.msk [vmem:[%s2420_s20 + $0x8] sm:$0xff] %vm102_vm0, %v1574_v7 }

</bundles_post_ra>
